<compile_context>
chip_gen: v7x
topology: tpu7x:2x2x1
jax: 0.10.0
libtpu: 0.0.40
codegen_flags: <defaults>
</compile_context>

<pallas_src>
import functools

import jax
import jax.numpy as jnp
from jax.experimental import pallas as pl
from jax.experimental.pallas import tpu as pltpu


def ffn_kernel(x_ref, w1_ref, b1_ref, w2_ref, b2_ref, o_ref):
    # x arrives f32; cast to bf16 in vregs (free filler under the MXU slot).
    x_bf = x_ref[...].astype(jnp.bfloat16)
    h = jnp.dot(x_bf, w1_ref[...], preferred_element_type=jnp.float32)
    h = jnp.maximum(h + b1_ref[...], 0.0)               # bias + relu in f32
    y = jnp.dot(h.astype(jnp.bfloat16), w2_ref[...],
                preferred_element_type=jnp.float32) + b2_ref[...]
    # trailing `x = x + x` folded into the epilogue (a few VALU ops, free).
    o_ref[...] = (2.0 * y).astype(o_ref.dtype)


def prepare_params(w1, b1, w2, b2):
    """One-time (init-time) prep: bf16 MXU weights, f32 (1, H) bias rows."""
    return (w1.astype(jnp.bfloat16),
            b1.reshape(1, -1).astype(jnp.float32),
            w2.astype(jnp.bfloat16),
            b2.reshape(1, -1).astype(jnp.float32))


def _pick_tile(batch):
    # Small batch: one grid step (grid=(1,)) -- the ~600-cycle per-step fixed
    # overhead dominates this tiny compute body on single-TC v5e/v6e.
    # Larger batch: tm=256 gives an even grid with >=2 steps per v7x core so
    # the BlockSpec pipeline actually overlaps DMA with compute.
    if batch <= 512:
        return batch
    for tm in (256, 128, 64, 32, 16, 8):
        if batch % tm == 0:
            return tm
    return batch


@functools.partial(jax.jit, static_argnames=("tm", "single_buffer_weights"))
def _ffn_impl(x, w1_bf, b1, w2_bf, b2, *, tm, single_buffer_weights):
    B, H = x.shape
    n_m = B // tm

    def const_spec(shape):
        if single_buffer_weights:
            return pl.BlockSpec(shape, lambda i: (0, 0),
                                pipeline_mode=pl.Buffered(1))
        return pl.BlockSpec(shape, lambda i: (0, 0))

    return pl.pallas_call(
        ffn_kernel,
        out_shape=jax.ShapeDtypeStruct((B, H), x.dtype),
        grid=(n_m,),
        in_specs=[
            pl.BlockSpec((tm, H), lambda i: (i, 0)),   # x tile, pipelined over M
            const_spec((H, H)),                        # w1 (bf16), VMEM-resident
            const_spec((1, H)),                        # b1 (f32)
            const_spec((H, H)),                        # w2 (bf16), VMEM-resident
            const_spec((1, H)),                        # b2 (f32)
        ],
        out_specs=pl.BlockSpec((tm, H), lambda i: (i, 0)),
        compiler_params=pltpu.CompilerParams(
            dimension_semantics=("parallel",),         # shards M across 2 TCs on v7x
        ),
    )(x, w1_bf, b1, w2_bf, b2)


def feed_forward(x, params, *, tm=None):
    """x: (B, H) f32; params = prepare_params(...). Returns 2*(relu(x@w1+b1)@w2+b2)."""
    B, H = x.shape
    assert H % 128 == 0, "hidden dim must be lane-aligned (multiple of 128)"
    if tm is None:
        tm = _pick_tile(B)
    assert B % tm == 0, "batch must be a multiple of the M tile"
    try:
        return _ffn_impl(x, *params, tm=tm, single_buffer_weights=True)
    except Exception:
        # Fallback for jax versions without pipeline_mode=pl.Buffered support:
        # identical semantics, default double-buffered weights.
        return _ffn_impl(x, *params, tm=tm, single_buffer_weights=False)


def feed_forward_ref(x, w1, b1, w2, b2):
    h = jnp.maximum(x @ w1 + b1, 0.0)
    y = h @ w2 + b2
    return y + y


if __name__ == "__main__":
    hidden_dim = 256   # matches the PyTorch module spec
    batch = 256

    key = jax.random.PRNGKey(0)
    kx, kw1, kb1, kw2, kb2 = jax.random.split(key, 5)

    # PyTorch nn.Linear default init: U(-1/sqrt(fan_in), 1/sqrt(fan_in))
    bound = 1.0 / (hidden_dim ** 0.5)
    x = jax.random.normal(kx, (batch, hidden_dim), dtype=jnp.float32)
    # weights stored pre-transposed: (in_features, out_features)
    w1 = jax.random.uniform(kw1, (hidden_dim, hidden_dim), jnp.float32, -bound, bound)
    b1 = jax.random.uniform(kb1, (1, hidden_dim), jnp.float32, -bound, bound)
    w2 = jax.random.uniform(kw2, (hidden_dim, hidden_dim), jnp.float32, -bound, bound)
    b2 = jax.random.uniform(kb2, (1, hidden_dim), jnp.float32, -bound, bound)

    # Init-time weight prep (cached; not part of the per-call path).
    params = prepare_params(w1, b1, w2, b2)

    out = feed_forward(x, params)
    out = jax.block_until_ready(out)

    ref = feed_forward_ref(x, w1, b1, w2, b2)
    assert out.shape == (batch, hidden_dim)
    # bf16 MXU inputs (f32 accumulate) -> small, bounded deviation vs f32 ref
    assert jnp.allclose(out, ref, atol=3e-2, rtol=3e-2), "mismatch vs reference"

    print("KERNEL_OK")
</pallas_src>

<mosaic_0001>
module attributes {stable_mosaic.version = 11 : i64} {
  func.func @ffn_kernel(%arg0: i32, %arg1: memref<256x256xf32, #tpu.memory_space<vmem>>, %arg2: memref<256x256xbf16, #tpu.memory_space<vmem>>, %arg3: memref<1x256xf32, #tpu.memory_space<vmem>>, %arg4: memref<256x256xbf16, #tpu.memory_space<vmem>>, %arg5: memref<1x256xf32, #tpu.memory_space<vmem>>, %arg6: memref<256x256xf32, #tpu.memory_space<vmem>>) attributes {dimension_semantics = [#tpu.dimension_semantics<parallel>], iteration_bounds = array<i64: 1>, scalar_prefetch = 0 : i64, scratch_operands = 0 : i64, tpu.core_type = #tpu.core_type<tc>, window_params = [{transform_indices = @transform_0, window_bounds = array<i64: 256, 256>}, {pipeline_mode = #tpu.pipeline_mode<synchronous>, transform_indices = @transform_1, window_bounds = array<i64: 256, 256>}, {pipeline_mode = #tpu.pipeline_mode<synchronous>, transform_indices = @transform_2, window_bounds = array<i64: 1, 256>}, {pipeline_mode = #tpu.pipeline_mode<synchronous>, transform_indices = @transform_3, window_bounds = array<i64: 256, 256>}, {pipeline_mode = #tpu.pipeline_mode<synchronous>, transform_indices = @transform_4, window_bounds = array<i64: 1, 256>}, {transform_indices = @transform_5, window_bounds = array<i64: 256, 256>}]} {
    %c0 = arith.constant 0 : index
    %c0_0 = arith.constant 0 : index
    %0 = vector.load %arg1[%c0, %c0_0] : memref<256x256xf32, #tpu.memory_space<vmem>>, vector<256x256xf32>
    %1 = arith.truncf %0 : vector<256x256xf32> to vector<256x256xbf16>
    %c0_1 = arith.constant 0 : index
    %c0_2 = arith.constant 0 : index
    %2 = vector.load %arg2[%c0_1, %c0_2] : memref<256x256xbf16, #tpu.memory_space<vmem>>, vector<256x256xbf16>
    %cst = arith.constant dense<0.000000e+00> : vector<256x256xf32>
    %3 = tpu.matmul %1, %2, %cst {dimension_numbers = #tpu.dot_dimension_numbers<[1], [0], [0], [1], [0, 0, 1, 1], [], []>} : vector<256x256xbf16>, vector<256x256xbf16>, vector<256x256xf32> -> vector<256x256xf32>
    %c0_3 = arith.constant 0 : index
    %c0_4 = arith.constant 0 : index
    %4 = vector.load %arg3[%c0_3, %c0_4] : memref<1x256xf32, #tpu.memory_space<vmem>>, vector<1x256xf32>
    %5 = vector.broadcast %4 : vector<1x256xf32> to vector<256x256xf32>
    %6 = arith.addf %3, %5 : vector<256x256xf32>
    %cst_5 = arith.constant 0.000000e+00 : f32
    %7 = vector.broadcast %cst_5 : f32 to vector<256x256xf32>
    %8 = arith.maximumf %6, %7 : vector<256x256xf32>
    %9 = arith.truncf %8 : vector<256x256xf32> to vector<256x256xbf16>
    %c0_6 = arith.constant 0 : index
    %c0_7 = arith.constant 0 : index
    %10 = vector.load %arg4[%c0_6, %c0_7] : memref<256x256xbf16, #tpu.memory_space<vmem>>, vector<256x256xbf16>
    %cst_8 = arith.constant dense<0.000000e+00> : vector<256x256xf32>
    %11 = tpu.matmul %9, %10, %cst_8 {dimension_numbers = #tpu.dot_dimension_numbers<[1], [0], [0], [1], [0, 0, 1, 1], [], []>} : vector<256x256xbf16>, vector<256x256xbf16>, vector<256x256xf32> -> vector<256x256xf32>
    %c0_9 = arith.constant 0 : index
    %c0_10 = arith.constant 0 : index
    %12 = vector.load %arg5[%c0_9, %c0_10] : memref<1x256xf32, #tpu.memory_space<vmem>>, vector<1x256xf32>
    %13 = vector.broadcast %12 : vector<1x256xf32> to vector<256x256xf32>
    %14 = arith.addf %11, %13 : vector<256x256xf32>
    %cst_11 = arith.constant 2.000000e+00 : f32
    %15 = vector.broadcast %cst_11 : f32 to vector<256x256xf32>
    %16 = arith.mulf %15, %14 : vector<256x256xf32>
    %c0_12 = arith.constant 0 : index
    %c0_13 = arith.constant 0 : index
    %17 = vector.load %arg6[%c0_12, %c0_13] : memref<256x256xf32, #tpu.memory_space<vmem>>, vector<256x256xf32>
    tpu.vector_store %arg6[%c0_12, %c0_13], %16 {strides = array<i32>} : memref<256x256xf32, #tpu.memory_space<vmem>>, vector<256x256xf32>,
    return
  }
  func.func @transform_0(%arg0: i32) -> (i32, i32) {
    %c0_i32 = arith.constant 0 : i32
    %c0_i32_0 = arith.constant 0 : i32
    return %arg0, %c0_i32 : i32, i32
  }
  func.func @transform_1(%arg0: i32) -> (i32, i32) {
    %c0_i32 = arith.constant 0 : i32
    %c0_i32_0 = arith.constant 0 : i32
    %c0_i32_1 = arith.constant 0 : i32
    return %c0_i32, %c0_i32_0 : i32, i32
  }
  func.func @transform_2(%arg0: i32) -> (i32, i32) {
    %c0_i32 = arith.constant 0 : i32
    %c0_i32_0 = arith.constant 0 : i32
    %c0_i32_1 = arith.constant 0 : i32
    return %c0_i32, %c0_i32_0 : i32, i32
  }
  func.func @transform_3(%arg0: i32) -> (i32, i32) {
    %c0_i32 = arith.constant 0 : i32
    %c0_i32_0 = arith.constant 0 : i32
    %c0_i32_1 = arith.constant 0 : i32
    return %c0_i32, %c0_i32_0 : i32, i32
  }
  func.func @transform_4(%arg0: i32) -> (i32, i32) {
    %c0_i32 = arith.constant 0 : i32
    %c0_i32_0 = arith.constant 0 : i32
    %c0_i32_1 = arith.constant 0 : i32
    return %c0_i32, %c0_i32_0 : i32, i32
  }
  func.func @transform_5(%arg0: i32) -> (i32, i32) {
    %c0_i32 = arith.constant 0 : i32
    %c0_i32_0 = arith.constant 0 : i32
    return %arg0, %c0_i32 : i32, i32
  }
}

module attributes {stable_mosaic.version = 11 : i64} {
  func.func @ffn_kernel(%arg0: i32, %arg1: memref<256x256xf32, #tpu.memory_space<vmem>>, %arg2: memref<256x256xbf16, #tpu.memory_space<vmem>>, %arg3: memref<1x256xf32, #tpu.memory_space<vmem>>, %arg4: memref<256x256xbf16, #tpu.memory_space<vmem>>, %arg5: memref<1x256xf32, #tpu.memory_space<vmem>>, %arg6: memref<256x256xf32, #tpu.memory_space<vmem>>) attributes {dimension_semantics = [#tpu.dimension_semantics<parallel>], iteration_bounds = array<i64: 1>, scalar_prefetch = 0 : i64, scratch_operands = 0 : i64, tpu.core_type = #tpu.core_type<tc>, window_params = [{transform_indices = @transform_0, window_bounds = array<i64: 256, 256>}, {pipeline_mode = #tpu.pipeline_mode<synchronous>, transform_indices = @transform_1, window_bounds = array<i64: 256, 256>}, {pipeline_mode = #tpu.pipeline_mode<synchronous>, transform_indices = @transform_2, window_bounds = array<i64: 1, 256>}, {pipeline_mode = #tpu.pipeline_mode<synchronous>, transform_indices = @transform_3, window_bounds = array<i64: 256, 256>}, {pipeline_mode = #tpu.pipeline_mode<synchronous>, transform_indices = @transform_4, window_bounds = array<i64: 1, 256>}, {transform_indices = @transform_5, window_bounds = array<i64: 256, 256>}]} {
    %c0 = arith.constant 0 : index
    %c0_0 = arith.constant 0 : index
    %0 = vector.load %arg1[%c0, %c0_0] : memref<256x256xf32, #tpu.memory_space<vmem>>, vector<256x256xf32>
    %1 = arith.truncf %0 : vector<256x256xf32> to vector<256x256xbf16>
    %c0_1 = arith.constant 0 : index
    %c0_2 = arith.constant 0 : index
    %2 = vector.load %arg2[%c0_1, %c0_2] : memref<256x256xbf16, #tpu.memory_space<vmem>>, vector<256x256xbf16>
    %cst = arith.constant dense<0.000000e+00> : vector<256x256xf32>
    %3 = tpu.matmul %1, %2, %cst {dimension_numbers = #tpu.dot_dimension_numbers<[1], [0], [0], [1], [0, 0, 1, 1], [], []>} : vector<256x256xbf16>, vector<256x256xbf16>, vector<256x256xf32> -> vector<256x256xf32>
    %c0_3 = arith.constant 0 : index
    %c0_4 = arith.constant 0 : index
    %4 = vector.load %arg3[%c0_3, %c0_4] : memref<1x256xf32, #tpu.memory_space<vmem>>, vector<1x256xf32>
    %5 = vector.broadcast %4 : vector<1x256xf32> to vector<256x256xf32>
    %6 = arith.addf %3, %5 : vector<256x256xf32>
    %cst_5 = arith.constant 0.000000e+00 : f32
    %7 = vector.broadcast %cst_5 : f32 to vector<256x256xf32>
    %8 = arith.maximumf %6, %7 : vector<256x256xf32>
    %9 = arith.truncf %8 : vector<256x256xf32> to vector<256x256xbf16>
    %c0_6 = arith.constant 0 : index
    %c0_7 = arith.constant 0 : index
    %10 = vector.load %arg4[%c0_6, %c0_7] : memref<256x256xbf16, #tpu.memory_space<vmem>>, vector<256x256xbf16>
    %cst_8 = arith.constant dense<0.000000e+00> : vector<256x256xf32>
    %11 = tpu.matmul %9, %10, %cst_8 {dimension_numbers = #tpu.dot_dimension_numbers<[1], [0], [0], [1], [0, 0, 1, 1], [], []>} : vector<256x256xbf16>, vector<256x256xbf16>, vector<256x256xf32> -> vector<256x256xf32>
    %c0_9 = arith.constant 0 : index
    %c0_10 = arith.constant 0 : index
    %12 = vector.load %arg5[%c0_9, %c0_10] : memref<1x256xf32, #tpu.memory_space<vmem>>, vector<1x256xf32>
    %13 = vector.broadcast %12 : vector<1x256xf32> to vector<256x256xf32>
    %14 = arith.addf %11, %13 : vector<256x256xf32>
    %cst_11 = arith.constant 2.000000e+00 : f32
    %15 = vector.broadcast %cst_11 : f32 to vector<256x256xf32>
    %16 = arith.mulf %15, %14 : vector<256x256xf32>
    %c0_12 = arith.constant 0 : index
    %c0_13 = arith.constant 0 : index
    %17 = vector.load %arg6[%c0_12, %c0_13] : memref<256x256xf32, #tpu.memory_space<vmem>>, vector<256x256xf32>
    tpu.vector_store %arg6[%c0_12, %c0_13], %16 {strides = array<i32>} : memref<256x256xf32, #tpu.memory_space<vmem>>, vector<256x256xf32>,
    return
  }
  func.func @transform_0(%arg0: i32) -> (i32, i32) {
    %c0_i32 = arith.constant 0 : i32
    %c0_i32_0 = arith.constant 0 : i32
    return %arg0, %c0_i32 : i32, i32
  }
  func.func @transform_1(%arg0: i32) -> (i32, i32) {
    %c0_i32 = arith.constant 0 : i32
    %c0_i32_0 = arith.constant 0 : i32
    %c0_i32_1 = arith.constant 0 : i32
    return %c0_i32, %c0_i32_0 : i32, i32
  }
  func.func @transform_2(%arg0: i32) -> (i32, i32) {
    %c0_i32 = arith.constant 0 : i32
    %c0_i32_0 = arith.constant 0 : i32
    %c0_i32_1 = arith.constant 0 : i32
    return %c0_i32, %c0_i32_0 : i32, i32
  }
  func.func @transform_3(%arg0: i32) -> (i32, i32) {
    %c0_i32 = arith.constant 0 : i32
    %c0_i32_0 = arith.constant 0 : i32
    %c0_i32_1 = arith.constant 0 : i32
    return %c0_i32, %c0_i32_0 : i32, i32
  }
  func.func @transform_4(%arg0: i32) -> (i32, i32) {
    %c0_i32 = arith.constant 0 : i32
    %c0_i32_0 = arith.constant 0 : i32
    %c0_i32_1 = arith.constant 0 : i32
    return %c0_i32, %c0_i32_0 : i32, i32
  }
  func.func @transform_5(%arg0: i32) -> (i32, i32) {
    %c0_i32 = arith.constant 0 : i32
    %c0_i32_0 = arith.constant 0 : i32
    return %arg0, %c0_i32 : i32, i32
  }
}

</mosaic_0001>

<bundles_post_ra>
// kernel: _ffn_impl.1
= control target key start
LH: loop header
LB: loop body
LE: loop exit
PB: predicated region body
PF: predicated region fallthrough
CT: control target
= control target key end

     0   :  { %10 = vsyncpa [#allocation3], 0  ;;  %s1708_s0 = inlined_call_operand.hbm [shape: f32[256,256], index: 0, kind: input, shape index: {}]   ;;  %s1709_s1 = inlined_call_operand.hbm [shape: bf16[256,256], index: 1, kind: input, shape index: {}]   ;;  %s1710_s2 = inlined_call_operand.vmem [shape: f32[1,256], index: 2, kind: input, shape index: {}]   ;;  %s1711_s3 = inlined_call_operand.hbm [shape: bf16[256,256], index: 3, kind: input, shape index: {}]   ;;  %s1712_s4 = inlined_call_operand.vmem [shape: f32[1,256], index: 4, kind: input, shape index: {}]   ;;  %s1713_s5 = inlined_call_operand.hbm [shape: f32[256,256], index: 5, kind: output, shape index: {}]  }
   0x1   :  { %11 = vsyncpa [#allocation6], 0 }
   0x2   :  { %12 = vsyncpa [#allocation4], 0  ;;  %s1456_s18 = smov [#allocation5]   ;;  %s1362_s22 = scalar_lea.hbm %s1709_s1, 4096 }
   0x3   :  { %s30_s19 = sshll.u32 %s1456_s18, 4  ;;  %p1363_p0 = scmp.ne.s32.totalorder %s1709_s1, %s1362_s22  ;;  %s31_s19 = int_to_ptr.vmem [resolvable:$true] %s30_s19 }
   0x4   :  { %p1366_p1 = scmp.lt.u32.totalorder %s1362_s22, %s1709_s1 }
   0x6   :  { %p1368_p2 = pnand %p1366_p1, %p1363_p0 }
   0x8   :  { %1371 = shalt.err (!%p1368_p2)
}
   0x9   :  { %s1372_s27 = scalar_lea.vmem %s31_s19, 4096  ;;  %p1377_p4 = scmp.lt.s32.totalorder %s31_s19, %s31_s19 }
   0xa   :  { %p1373_p3 = scmp.ne.s32.totalorder %s31_s19, %s1372_s27  ;;  %p1378_p5 = scmp.lt.s32.totalorder %s1372_s27, %s1372_s27 }
   0xc   :  { %p1379_p6 = por %p1378_p5, %p1377_p4 }
   0xe   :  { %p1380_p7 = pnand %p1379_p6, %p1373_p3 }
  0x10   :  { %1383 = shalt.err (!%p1380_p7)
}
  0x11   :  { %s1457_s28 = smov 128   ;;  %s1458_s29 = smov 8  }
  0x12   :  { %36 = dma.hbm_to_vmem [thread:$0]  %s1709_s1, 4096, %s31_s19, [#allocation6], %s1457_s28, %s1457_s28, %s1458_s29  }
  0x13   :  { %s1459_s7 = smov [#allocation2]   ;;  %s1384_s11 = scalar_lea.hbm %s1708_s0, 8192 }
  0x14   :  { %s18_s8 = sshll.u32 %s1459_s7, 4  ;;  %p1385_p8 = scmp.ne.s32.totalorder %s1708_s0, %s1384_s11  ;;  %s19_s8 = int_to_ptr.vmem [resolvable:$true] %s18_s8 }
  0x15   :  { %p1388_p9 = scmp.lt.u32.totalorder %s1384_s11, %s1708_s0 }
  0x17   :  { %p1390_p10 = pnand %p1388_p9, %p1385_p8 }
  0x19   :  { %1393 = shalt.err (!%p1390_p10)
}
  0x1a   :  { %s1394_s16 = scalar_lea.vmem %s19_s8, 8192  ;;  %p1399_p12 = scmp.lt.s32.totalorder %s19_s8, %s19_s8 }
  0x1b   :  { %p1395_p11 = scmp.ne.s32.totalorder %s19_s8, %s1394_s16  ;;  %p1400_p13 = scmp.lt.s32.totalorder %s1394_s16, %s1394_s16 }
  0x1d   :  { %p1401_p0 = por %p1400_p13, %p1399_p12 }
  0x1f   :  { %p1402_p1 = pnand %p1401_p0, %p1395_p11 }
  0x21   :  { %1405 = shalt.err (!%p1402_p1)
}
  0x22   :  { %s1460_s1 = smov 256   ;;  %s1461_s17 = smov 16  }
  0x23   :  { %24 = dma.hbm_to_vmem [thread:$0]  %s1708_s0, 8192, %s19_s8, [#allocation3], %s1460_s1, %s1460_s1, %s1461_s17  }
  0x24   :  { %s1462_s20 = smov [#allocation7]   ;;  %s1406_s24 = scalar_lea.hbm %s1711_s3, 4096 }
  0x25   :  { %s44_s21 = sshll.u32 %s1462_s20, 4  ;;  %p1407_p2 = scmp.ne.s32.totalorder %s1711_s3, %s1406_s24  ;;  %s45_s21 = int_to_ptr.vmem [resolvable:$true] %s44_s21 }
  0x26   :  { %p1410_p3 = scmp.lt.u32.totalorder %s1406_s24, %s1711_s3 }
  0x28   :  { %p1412_p4 = pnand %p1410_p3, %p1407_p2 }
  0x2a   :  { %1415 = shalt.err (!%p1412_p4)
}
  0x2b   :  { %s1416_s6 = scalar_lea.vmem %s45_s21, 4096  ;;  %p1421_p6 = scmp.lt.s32.totalorder %s45_s21, %s45_s21 }
  0x2c   :  { %p1417_p5 = scmp.ne.s32.totalorder %s45_s21, %s1416_s6  ;;  %p1422_p7 = scmp.lt.s32.totalorder %s1416_s6, %s1416_s6 }
  0x2e   :  { %p1423_p8 = por %p1422_p7, %p1421_p6 }
  0x30   :  { %p1424_p9 = pnand %p1423_p8, %p1417_p5 }
  0x32   :  { %1427 = shalt.err (!%p1424_p9)
}
  0x33   :  { %50 = dma.hbm_to_vmem [thread:$0]  %s1711_s3, 4096, %s45_s21, [#allocation6], %s1457_s28, %s1457_s28, %s1458_s29  }
  0x34   :  { %1450 = dma.done.wait [#allocation3], 8192  }
  0x35   :  { %1451 = vsyncadd [#allocation3], 4294959104 }
  0x36   :  { %1452 = dma.done.wait [#allocation6], 8192  }
  0x37   :  { %1453 = vsyncadd [#allocation6], 4294959104  ;;  %v1266_v0 = vld [vmem:[#allocation5 + $0x4] ss:$8 sps:$4 sm:$0xff]   ;;  %v1268_v1 = vld [vmem:[#allocation5] ss:$8 sps:$4 sm:$0xff]  }
  0x38   :  { %362 = vmatprep.subr.bf16.mxu0 %v1266_v0  ;;  %v1269_v2 = vld [vmem:[#allocation5 + $0x14] ss:$8 sps:$4 sm:$0xff]   ;;  %v1271_v3 = vld [vmem:[#allocation5 + $0x10] ss:$8 sps:$4 sm:$0xff]   ;;  %v1272_v4 = vld [vmem:[#allocation5 + $0x24] ss:$8 sps:$4 sm:$0xff]  }
  0x39   :  { %363 = vmatpush1.bf16.msra.mxu0 %v1268_v1  ;;  %v1274_v5 = vld [vmem:[#allocation5 + $0x20] ss:$8 sps:$4 sm:$0xff]   ;;  %v1275_v6 = vld [vmem:[#allocation5 + $0x34] ss:$8 sps:$4 sm:$0xff]   ;;  %v1277_v7 = vld [vmem:[#allocation5 + $0x30] ss:$8 sps:$4 sm:$0xff]  }
  0x3a   :  { %364 = vmatprep.subr.bf16.mxu0 %v1269_v2  ;;  %v1278_v8 = vld [vmem:[#allocation5 + $0x44] ss:$8 sps:$4 sm:$0xff]   ;;  %v1280_v9 = vld [vmem:[#allocation5 + $0x40] ss:$8 sps:$4 sm:$0xff]   ;;  %v1281_v10 = vld [vmem:[#allocation5 + $0x54] ss:$8 sps:$4 sm:$0xff]  }
  0x3b   :  { %v1283_v11 = vld [vmem:[#allocation5 + $0x50] ss:$8 sps:$4 sm:$0xff]   ;;  %v1284_v12 = vld [vmem:[#allocation5 + $0x64] ss:$8 sps:$4 sm:$0xff]   ;;  %v1286_v16 = vld [vmem:[#allocation5 + $0x60] ss:$8 sps:$4 sm:$0xff]  }
  0x3c   :  { %v63_v13 = vld [vmem:[#allocation2 + $0x8] sm:$0xff]  ;;  %v65_v14 = vld [vmem:[#allocation2 + $0x18] sm:$0xff]  ;;  %v62_v38 = vld [vmem:[#allocation2] sm:$0xff] }
  0x3d   :  { %365 = vmatpush1.bf16.msra.mxu0 %v1271_v3  ;;  %v127_v15 = vpack.c.bf16 %v65_v14, %v63_v13  ;;  %v1287_v17 = vld [vmem:[#allocation5 + $0x74] ss:$8 sps:$4 sm:$0xff]   ;;  %v1289_v18 = vld [vmem:[#allocation5 + $0x70] ss:$8 sps:$4 sm:$0xff]   ;;  %v1290_v19 = vld [vmem:[#allocation5 + $0x84] ss:$8 sps:$4 sm:$0xff]  }
  0x3e   :  { %366 = vmatprep.subr.bf16.mxu0 %v1272_v4  ;;  %v1292_v20 = vld [vmem:[#allocation5 + $0x80] ss:$8 sps:$4 sm:$0xff]   ;;  %v1293_v21 = vld [vmem:[#allocation5 + $0x94] ss:$8 sps:$4 sm:$0xff]   ;;  %v1295_v22 = vld [vmem:[#allocation5 + $0x90] ss:$8 sps:$4 sm:$0xff]  }
  0x3f   :  { %394 = vmatprep.mubr.bf16.mxu0 %v127_v15  ;;  %v1296_v23 = vld [vmem:[#allocation5 + $0xa4] ss:$8 sps:$4 sm:$0xff]   ;;  %v1298_v24 = vld [vmem:[#allocation5 + $0xa0] ss:$8 sps:$4 sm:$0xff]   ;;  %v1299_v25 = vld [vmem:[#allocation5 + $0xb4] ss:$8 sps:$4 sm:$0xff]  }
  0x40   :  { %v1301_v26 = vld [vmem:[#allocation5 + $0xb0] ss:$8 sps:$4 sm:$0xff]   ;;  %v1302_v27 = vld [vmem:[#allocation5 + $0xc4] ss:$8 sps:$4 sm:$0xff]   ;;  %v1304_v28 = vld [vmem:[#allocation5 + $0xc0] ss:$8 sps:$4 sm:$0xff]  }
  0x41   :  { %367 = vmatpush1.bf16.msra.mxu0 %v1274_v5  ;;  %v1305_v29 = vld [vmem:[#allocation5 + $0xd4] ss:$8 sps:$4 sm:$0xff]   ;;  %v1307_v30 = vld [vmem:[#allocation5 + $0xd0] ss:$8 sps:$4 sm:$0xff]   ;;  %v1308_v31 = vld [vmem:[#allocation5 + $0xe4] ss:$8 sps:$4 sm:$0xff]  }
  0x42   :  { %368 = vmatprep.subr.bf16.mxu0 %v1275_v6  ;;  %v1310_v32 = vld [vmem:[#allocation5 + $0xe0] ss:$8 sps:$4 sm:$0xff]   ;;  %v1311_v33 = vld [vmem:[#allocation5 + $0xf4] ss:$8 sps:$4 sm:$0xff]   ;;  %v1314_v34 = vld [vmem:[#allocation7 + $0x4] ss:$8 sps:$4 sm:$0xff]  }
  0x43   :  { %v1316_v35 = vld [vmem:[#allocation7] ss:$8 sps:$4 sm:$0xff]   ;;  %v1317_v36 = vld [vmem:[#allocation7 + $0x14] ss:$8 sps:$4 sm:$0xff]   ;;  %v1313_v37 = vld [vmem:[#allocation5 + $0xf0] ss:$8 sps:$4 sm:$0xff]   ;;  %855 = vmatprep.subr.bf16.mxu1 %v1314_v34 }
  0x44   :  { %v64_v39 = vld [vmem:[#allocation2 + $0x10] sm:$0xff]  ;;  %v67_v40 = vld [vmem:[#allocation2 + $0x28] sm:$0xff]  ;;  %v69_v41 = vld [vmem:[#allocation2 + $0x38] sm:$0xff]  ;;  %856 = vmatpush1.bf16.msra.mxu1 %v1316_v35 }
  0x45   :  { %369 = vmatpush1.bf16.msra.mxu0 %v1277_v7  ;;  %v1319_v42 = vld [vmem:[#allocation7 + $0x10] ss:$8 sps:$4 sm:$0xff]   ;;  %v126_v43 = vpack.c.bf16 %v64_v39, %v62_v38  ;;  %857 = vmatprep.subr.bf16.mxu1 %v1317_v36  ;;  %v1320_v44 = vld [vmem:[#allocation7 + $0x24] ss:$8 sps:$4 sm:$0xff]   ;;  %v129_v45 = vpack.c.bf16 %v69_v41, %v67_v40  ;;  %v1322_v46 = vld [vmem:[#allocation7 + $0x20] ss:$8 sps:$4 sm:$0xff]  }
  0x46   :  { %370 = vmatprep.subr.bf16.mxu0 %v1278_v8  ;;  %v1323_v47 = vld [vmem:[#allocation7 + $0x34] ss:$8 sps:$4 sm:$0xff]   ;;  %v66_v48 = vld [vmem:[#allocation2 + $0x20] sm:$0xff]  ;;  %v71_v50 = vld [vmem:[#allocation2 + $0x48] sm:$0xff] }
  0x47   :  { %v68_v49 = vld [vmem:[#allocation2 + $0x30] sm:$0xff]  ;;  %v73_v51 = vld [vmem:[#allocation2 + $0x58] sm:$0xff]  ;;  %v1326_v54 = vld [vmem:[#allocation7 + $0x44] ss:$8 sps:$4 sm:$0xff]  }
  0x48   :  { %858 = vmatpush1.bf16.msra.mxu1 %v1319_v42  ;;  %v1325_v52 = vld [vmem:[#allocation7 + $0x30] ss:$8 sps:$4 sm:$0xff]   ;;  %v128_v53 = vpack.c.bf16 %v68_v49, %v66_v48  ;;  %v131_v55 = vpack.c.bf16 %v73_v51, %v71_v50  ;;  %v1328_v56 = vld [vmem:[#allocation7 + $0x40] ss:$8 sps:$4 sm:$0xff]   ;;  %v1329_v57 = vld [vmem:[#allocation7 + $0x54] ss:$8 sps:$4 sm:$0xff]  }
  0x49   :  { %371 = vmatpush1.bf16.msra.mxu0 %v1280_v9  ;;  %859 = vmatprep.subr.bf16.mxu1 %v1320_v44  ;;  %v70_v58 = vld [vmem:[#allocation2 + $0x40] sm:$0xff]  ;;  %v72_v59 = vld [vmem:[#allocation2 + $0x50] sm:$0xff]  ;;  %v75_v60 = vld [vmem:[#allocation2 + $0x68] sm:$0xff] }
  0x4a   :  { %372 = vmatprep.subr.bf16.mxu0 %v1281_v10  ;;  %v77_v61 = vld [vmem:[#allocation2 + $0x78] sm:$0xff]  ;;  %v130_v63 = vpack.c.bf16 %v72_v59, %v70_v58  ;;  %v1332_v0 = vld [vmem:[#allocation7 + $0x64] ss:$8 sps:$4 sm:$0xff]   ;;  %v1334_v2 = vld [vmem:[#allocation7 + $0x60] ss:$8 sps:$4 sm:$0xff]  }
  0x4b   :  { %v1331_v62 = vld [vmem:[#allocation7 + $0x50] ss:$8 sps:$4 sm:$0xff]   ;;  %v133_v1 = vpack.c.bf16 %v77_v61, %v75_v60  ;;  %v1335_v3 = vld [vmem:[#allocation7 + $0x74] ss:$8 sps:$4 sm:$0xff]   ;;  %v74_v4 = vld [vmem:[#allocation2 + $0x60] sm:$0xff] }
  0x4c   :  { %860 = vmatpush1.bf16.msra.mxu1 %v1322_v46  ;;  %v76_v5 = vld [vmem:[#allocation2 + $0x70] sm:$0xff]  ;;  %v79_v6 = vld [vmem:[#allocation2 + $0x88] sm:$0xff]  ;;  %v81_v7 = vld [vmem:[#allocation2 + $0x98] sm:$0xff] }
  0x4d   :  { %373 = vmatpush1.bf16.msra.mxu0 %v1283_v11  ;;  %861 = vmatprep.subr.bf16.mxu1 %v1323_v47  ;;  %v1337_v8 = vld [vmem:[#allocation7 + $0x70] ss:$8 sps:$4 sm:$0xff]   ;;  %v132_v9 = vpack.c.bf16 %v76_v5, %v74_v4  ;;  %v1338_v10 = vld [vmem:[#allocation7 + $0x84] ss:$8 sps:$4 sm:$0xff]   ;;  %v135_v11 = vpack.c.bf16 %v81_v7, %v79_v6  ;;  %v1341_v13 = vld [vmem:[#allocation7 + $0x94] ss:$8 sps:$4 sm:$0xff]  }
  0x4e   :  { %374 = vmatprep.subr.bf16.mxu0 %v1284_v12  ;;  %v1340_v12 = vld [vmem:[#allocation7 + $0x80] ss:$8 sps:$4 sm:$0xff]   ;;  %v80_v15 = vld [vmem:[#allocation2 + $0x90] sm:$0xff]  ;;  %v101_v49 = vld [vmem:[#allocation2 + $0x138] sm:$0xff] }
  0x4f   :  { %v78_v14 = vld [vmem:[#allocation2 + $0x80] sm:$0xff]  ;;  %v88_v35 = vld [vmem:[#allocation2 + $0xd0] sm:$0xff]  ;;  %v91_v36 = vld [vmem:[#allocation2 + $0xe8] sm:$0xff] }
  0x50   :  { %862 = vmatpush1.bf16.msra.mxu1 %v1325_v52  ;;  %v86_v34 = vld [vmem:[#allocation2 + $0xc0] sm:$0xff]  ;;  %v92_v41 = vld [vmem:[#allocation2 + $0xf0] sm:$0xff]  ;;  %v95_v42 = vld [vmem:[#allocation2 + $0x108] sm:$0xff] }
  0x51   :  { %375 = vmatpush1.bf16.msra.mxu0 %v1286_v16  ;;  %863 = vmatprep.subr.bf16.mxu1 %v1326_v54  ;;  %v83_v16 = vld [vmem:[#allocation2 + $0xa8] sm:$0xff]  ;;  %v138_v38 = vpack.c.bf16 %v88_v35, %v86_v34  ;;  %v90_v40 = vld [vmem:[#allocation2 + $0xe0] sm:$0xff]  ;;  %v96_v47 = vld [vmem:[#allocation2 + $0x110] sm:$0xff] }
  0x52   :  { %376 = vmatprep.subr.bf16.mxu0 %v1287_v17  ;;  %v85_v17 = vld [vmem:[#allocation2 + $0xb8] sm:$0xff]  ;;  %v140_v44 = vpack.c.bf16 %v92_v41, %v90_v40  ;;  %v94_v46 = vld [vmem:[#allocation2 + $0x100] sm:$0xff]  ;;  %v99_v48 = vld [vmem:[#allocation2 + $0x128] sm:$0xff] }
  0x53   :  { %v142_v50 = vpack.c.bf16 %v96_v47, %v94_v46  ;;  %v145_v51 = vpack.c.bf16 %v101_v49, %v99_v48  ;;  %v98_v52 = vld [vmem:[#allocation2 + $0x120] sm:$0xff]  ;;  %v103_v54 = vld [vmem:[#allocation2 + $0x148] sm:$0xff]  ;;  %v104_v59 = vld [vmem:[#allocation2 + $0x150] sm:$0xff] }
  0x54   :  { %864 = vmatpush1.bf16.msra.mxu1 %v1328_v56  ;;  %v102_v58 = vld [vmem:[#allocation2 + $0x140] sm:$0xff]  ;;  %v107_v60 = vld [vmem:[#allocation2 + $0x168] sm:$0xff]  ;;  %v109_v61 = vld [vmem:[#allocation2 + $0x178] sm:$0xff] }
  0x55   :  { %377 = vmatpush1.bf16.msra.mxu0 %v1289_v18  ;;  %865 = vmatprep.subr.bf16.mxu1 %v1329_v57  ;;  %v1343_v18 = vld [vmem:[#allocation7 + $0x90] ss:$8 sps:$4 sm:$0xff]   ;;  %v1356_v6 = vld [vmem:[#allocation7 + $0xe4] ss:$8 sps:$4 sm:$0xff]   ;;  %v190_v35 = vld [vmem:[%s1710_s2] sm:$0x3] }
  0x56   :  { %378 = vmatprep.subr.bf16.mxu0 %v1290_v19  ;;  %v134_v19 = vpack.c.bf16 %v80_v15, %v78_v14  ;;  %v113_v4 = vld [vmem:[#allocation2 + $0x198] sm:$0xff] }
  0x57   :  { %v117_v14 = vld [vmem:[#allocation2 + $0x1b8] sm:$0xff] }
  0x58   :  { %866 = vmatpush1.bf16.msra.mxu1 %v1331_v62  ;;  %v146_v62 = vpack.c.bf16 %v104_v59, %v102_v58 }
  0x59   :  { %379 = vmatpush1.bf16.msra.mxu0 %v1292_v20  ;;  %867 = vmatprep.subr.bf16.mxu1 %v1332_v0  ;;  %v1344_v20 = vld [vmem:[#allocation7 + $0xa4] ss:$8 sps:$4 sm:$0xff]  }
  0x5a   :  { %380 = vmatprep.subr.bf16.mxu0 %v1293_v21  ;;  %v137_v21 = vpack.c.bf16 %v85_v17, %v83_v16  ;;  %v106_v0 = vld [vmem:[#allocation2 + $0x160] sm:$0xff] }
  0x5b   :  { %v114_v17 = vld [vmem:[#allocation2 + $0x1a0] sm:$0xff] }
  0x5c   :  { %868 = vmatpush1.bf16.msra.mxu1 %v1334_v2  ;;  %v1355_v2 = vld [vmem:[#allocation7 + $0xd0] ss:$8 sps:$4 sm:$0xff]  }
  0x5d   :  { %381 = vmatpush1.bf16.msra.mxu0 %v1295_v22  ;;  %869 = vmatprep.subr.bf16.mxu1 %v1335_v3  ;;  %v1346_v22 = vld [vmem:[#allocation7 + $0xa0] ss:$8 sps:$4 sm:$0xff]  }
  0x5e   :  { %382 = vmatprep.subr.bf16.mxu0 %v1296_v23  ;;  %v1347_v23 = vld [vmem:[#allocation7 + $0xb4] ss:$8 sps:$4 sm:$0xff]   ;;  %v111_v3 = vld [vmem:[#allocation2 + $0x188] sm:$0xff] }
  0x5f   :  { %v151_v7 = vpack.c.bf16 %v113_v4, %v111_v3 }
  0x60   :  { %870 = vmatpush1.bf16.msra.mxu1 %v1337_v8  ;;  %v1358_v8 = vld [vmem:[#allocation7 + $0xe0] ss:$8 sps:$4 sm:$0xff]  }
  0x61   :  { %383 = vmatpush1.bf16.msra.mxu0 %v1298_v24  ;;  %871 = vmatprep.subr.bf16.mxu1 %v1338_v10  ;;  %v82_v24 = vld [vmem:[#allocation2 + $0xa0] sm:$0xff] }
  0x62   :  { %384 = vmatprep.subr.bf16.mxu0 %v1299_v25  ;;  %v84_v25 = vld [vmem:[#allocation2 + $0xb0] sm:$0xff]  ;;  %v110_v10 = vld [vmem:[#allocation2 + $0x180] sm:$0xff] }
  0x64   :  { %872 = vmatpush1.bf16.msra.mxu1 %v1340_v12  ;;  %v1361_v12 = vld [vmem:[#allocation7 + $0xf0] ss:$8 sps:$4 sm:$0xff]  }
  0x65   :  { %385 = vmatpush1.bf16.msra.mxu0 %v1301_v26  ;;  %873 = vmatprep.subr.bf16.mxu1 %v1341_v13  ;;  %v87_v26 = vld [vmem:[#allocation2 + $0xc8] sm:$0xff] }
  0x66   :  { %386 = vmatprep.subr.bf16.mxu0 %v1302_v27  ;;  %v89_v27 = vld [vmem:[#allocation2 + $0xd8] sm:$0xff]  ;;  %v115_v13 = vld [vmem:[#allocation2 + $0x1a8] sm:$0xff] }
  0x67   :  { %v153_v16 = vpack.c.bf16 %v117_v14, %v115_v13 }
  0x68   :  { %874 = vmatpush1.bf16.msra.mxu1 %v1343_v18  ;;  %v116_v18 = vld [vmem:[#allocation2 + $0x1b0] sm:$0xff] }
  0x69   :  { %387 = vmatpush1.bf16.msra.mxu0 %v1304_v28  ;;  %875 = vmatprep.subr.bf16.mxu1 %v1344_v20  ;;  %v1349_v28 = vld [vmem:[#allocation7 + $0xb0] ss:$8 sps:$4 sm:$0xff]  }
  0x6a   :  { %388 = vmatprep.subr.bf16.mxu0 %v1305_v29  ;;  %v136_v29 = vpack.c.bf16 %v84_v25, %v82_v24  ;;  %v121_v20 = vld [vmem:[#allocation2 + $0x1d8] sm:$0xff]  ;;  %v120_v24 = vld [vmem:[#allocation2 + $0x1d0] sm:$0xff]  ;;  %v123_v25 = vld [vmem:[#allocation2 + $0x1e8] sm:$0xff] }
  0x6c   :  { %876 = vmatpush1.bf16.msra.mxu1 %v1346_v22 }
  0x6d   :  { %389 = vmatpush1.bf16.msra.mxu0 %v1307_v30  ;;  %877 = vmatprep.subr.bf16.mxu1 %v1347_v23  ;;  %v1350_v30 = vld [vmem:[#allocation7 + $0xc4] ss:$8 sps:$4 sm:$0xff]  }
  0x6e   :  { %390 = vmatprep.subr.bf16.mxu0 %v1308_v31  ;;  %v139_v31 = vpack.c.bf16 %v89_v27, %v87_v26  ;;  %v118_v23 = vld [vmem:[#allocation2 + $0x1c0] sm:$0xff]  ;;  %v125_v26 = vld [vmem:[#allocation2 + $0x1f8] sm:$0xff] }
  0x6f   :  { %v154_v27 = vpack.c.bf16 %v120_v24, %v118_v23 }
  0x70   :  { %878 = vmatpush1.bf16.msra.mxu1 %v1349_v28  ;;  %v157_v28 = vpack.c.bf16 %v125_v26, %v123_v25 }
  0x71   :  { %391 = vmatpush1.bf16.msra.mxu0 %v1310_v32  ;;  %v1352_v32 = vld [vmem:[#allocation7 + $0xc0] ss:$8 sps:$4 sm:$0xff]   ;;  %879 = vmatprep.subr.bf16.mxu1 %v1350_v30  ;;  %v124_v30 = vld [vmem:[#allocation2 + $0x1f0] sm:$0xff] }
  0x72   :  { %392 = vmatprep.subr.bf16.mxu0 %v1311_v33  ;;  %v1353_v33 = vld [vmem:[#allocation7 + $0xd4] ss:$8 sps:$4 sm:$0xff]  }
  0x74   :  { %880 = vmatpush1.bf16.msra.mxu1 %v1352_v32  ;;  %v192_v32 = vlaneseq }
  0x75   :  { %393 = vmatpush1.bf16.msra.mxu0 %v1313_v37  ;;  %v93_v37 = vld [vmem:[#allocation2 + $0xf8] sm:$0xff]  ;;  %881 = vmatprep.subr.bf16.mxu1 %v1353_v33 }
  0x76   :  { %v141_v39 = vpack.c.bf16 %v93_v37, %v91_v36  ;;  %v1539_v33 = vshrl.u32 %v192_v32, 7 }
  0x78   :  { %395 = vmatmul.mubr.bf16.vlgmr.msra.gmra.mrb[0].mxu0 %v126_v43  ;;  %v97_v43 = vld [vmem:[#allocation2 + $0x118] sm:$0xff]  ;;  %882 = vmatpush1.bf16.msra.mxu1 %v1355_v2  ;;  %v194_v34 = vsub.s32 0, %v1539_v33  ;;  %v198_v36 = vsub.s32 1, %v1539_v33 }
  0x79   :  { %404 = vmatprep.mubr.bf16.mxu0 %v129_v45  ;;  %v143_v45 = vpack.c.bf16 %v97_v43, %v95_v42  ;;  %883 = vmatprep.subr.bf16.mxu1 %v1356_v6 }
  0x7a   :  { %v1548_v37 = vrot.slane %v190_v35, %v194_v34 }
  0x7c   :  { %884 = vmatpush1.bf16.msra.mxu1 %v1358_v8 }
  0x80   :  { %405 = vmatmul.mubr.bf16.gmra.mrb[4].mxu0 %v128_v53  ;;  %v100_v53 = vld [vmem:[#allocation2 + $0x130] sm:$0xff] }
  0x81   :  { %414 = vmatprep.mubr.bf16.mxu0 %v131_v55  ;;  %v105_v55 = vld [vmem:[#allocation2 + $0x158] sm:$0xff]  ;;  %v144_v56 = vpack.c.bf16 %v100_v53, %v98_v52 }
  0x82   :  { %v147_v57 = vpack.c.bf16 %v105_v55, %v103_v54 }
  0x88   :  { %415 = vmatmul.mubr.bf16.gmra.mrb[8].mxu0 %v130_v63  ;;  %v149_v63 = vpack.c.bf16 %v109_v61, %v107_v60 }
  0x89   :  { %424 = vmatprep.mubr.bf16.mxu0 %v133_v1  ;;  %v108_v1 = vld [vmem:[#allocation2 + $0x170] sm:$0xff] }
  0x8a   :  { %v148_v5 = vpack.c.bf16 %v108_v1, %v106_v0 }
  0x90   :  { %425 = vmatmul.mubr.bf16.gmra.mrb[12].mxu0 %v132_v9  ;;  %v1359_v9 = vld [vmem:[#allocation7 + $0xf4] ss:$8 sps:$4 sm:$0xff]  }
  0x91   :  { %434 = vmatprep.mubr.bf16.mxu0 %v135_v11  ;;  %v112_v11 = vld [vmem:[#allocation2 + $0x190] sm:$0xff]  ;;  %885 = vmatprep.subr.bf16.mxu1 %v1359_v9 }
  0x92   :  { %886 = vmatpush1.bf16.msra.mxu1 %v1361_v12  ;;  %v150_v15 = vpack.c.bf16 %v112_v11, %v110_v10 }
  0x98   :  { %435 = vmatmul.mubr.bf16.gmra.mrb[16].mxu0 %v134_v19  ;;  %v119_v19 = vld [vmem:[#allocation2 + $0x1c8] sm:$0xff] }
  0x99   :  { %444 = vmatprep.mubr.bf16.mxu0 %v137_v21  ;;  %v152_v21 = vpack.c.bf16 %v116_v18, %v114_v17  ;;  %v155_v22 = vpack.c.bf16 %v121_v20, %v119_v19 }
  0xa0   :  { %445 = vmatmul.mubr.bf16.gmra.mrb[20].mxu0 %v136_v29  ;;  %v122_v29 = vld [vmem:[#allocation2 + $0x1e0] sm:$0xff] }
  0xa1   :  { %454 = vmatprep.mubr.bf16.mxu0 %v139_v31  ;;  %v156_v31 = vpack.c.bf16 %v124_v30, %v122_v29 }
  0xa8   :  { %455 = vmatmul.mubr.bf16.gmra.mrb[24].mxu0 %v138_v38  ;;  %v1552_v38 = vrot.slane %v190_v35, %v198_v36 }
  0xa9   :  { %464 = vmatprep.mubr.bf16.mxu0 %v141_v39 }
  0xb0   :  { %465 = vmatmul.mubr.bf16.gmra.mrb[28].mxu0 %v140_v44 }
  0xb1   :  { %474 = vmatprep.mubr.bf16.mxu0 %v143_v45 }
  0xb8   :  { %475 = vmatmul.mubr.bf16.gmra.mrb[32].mxu0 %v142_v50 }
  0xb9   :  { %484 = vmatprep.mubr.bf16.mxu0 %v145_v51 }
  0xc0   :  { %485 = vmatmul.mubr.bf16.gmra.mrb[36].mxu0 %v144_v56 }
  0xc1   :  { %494 = vmatprep.mubr.bf16.mxu0 %v147_v57 }
  0xc8   :  { %495 = vmatmul.mubr.bf16.gmra.mrb[40].mxu0 %v146_v62 }
  0xc9   :  { %504 = vmatprep.mubr.bf16.mxu0 %v149_v63 }
  0xd0   :  { %505 = vmatmul.mubr.bf16.gmra.mrb[44].mxu0 %v148_v5 }
  0xd1   :  { %514 = vmatprep.mubr.bf16.mxu0 %v151_v7 }
  0xd8   :  { %515 = vmatmul.mubr.bf16.gmra.mrb[48].mxu0 %v150_v15 }
  0xd9   :  { %524 = vmatprep.mubr.bf16.mxu0 %v153_v16 }
  0xe0   :  { %525 = vmatmul.mubr.bf16.gmra.mrb[52].mxu0 %v152_v21 }
  0xe1   :  { %534 = vmatprep.mubr.bf16.mxu0 %v155_v22 }
  0xe8   :  { %535 = vmatmul.mubr.bf16.gmra.mrb[56].mxu0 %v154_v27 }
  0xe9   :  { %544 = vmatprep.mubr.bf16.mxu0 %v157_v28 }
  0xf0   :  { %545 = vmatmul.mubr.bf16.gmra.mrb[60].mxu0 %v156_v31 }
 0x14b   :  { %v396_v39 = vpop.f32.mrb[0].mxu0 }
 0x14c   :  { %v397_v40 = vadd.f32 %v396_v39, %v1548_v37  ;;  %v398_v41 = vpop.f32.mrb[1].mxu0 }
 0x14d   :  { %v399_v42 = vadd.f32 %v398_v41, %v1552_v38  ;;  %v400_v43 = vpop.f32.mrb[2].mxu0 }
 0x14e   :  { %v401_v44 = vadd.f32 %v400_v43, %v1548_v37  ;;  %v402_v45 = vpop.f32.mrb[3].mxu0  ;;  %v555_v47 = vmax.f32 %v397_v40, 0.0 }
 0x14f   :  { %v403_v46 = vadd.f32 %v402_v45, %v1552_v38  ;;  %v556_v49 = vmax.f32 %v399_v42, 0.0 }
 0x150   :  { %v557_v48 = vmax.f32 %v401_v44, 0.0 }
 0x151   :  { %v558_v50 = vmax.f32 %v403_v46, 0.0 }
 0x152   :  { %v619_v51 = vpack.c.bf16 %v557_v48, %v555_v47 }
 0x153   :  { %v406_v52 = vpop.f32.mrb[4].mxu0  ;;  %v620_v53 = vpack.c.bf16 %v558_v50, %v556_v49 }
 0x154   :  { %v407_v54 = vadd.f32 %v406_v52, %v1548_v37  ;;  %v408_v55 = vpop.f32.mrb[5].mxu0 }
 0x155   :  { %v409_v56 = vadd.f32 %v408_v55, %v1552_v38  ;;  %v410_v57 = vpop.f32.mrb[6].mxu0  ;;  %887 = vmatprep.mubr.bf16.mxu1 %v620_v53 }
 0x156   :  { %v411_v58 = vadd.f32 %v410_v57, %v1548_v37  ;;  %v412_v59 = vpop.f32.mrb[7].mxu0  ;;  %888 = vmatmul.mubr.bf16.vlgmr.msra.gmra.mrb[0].mxu1 %v619_v51  ;;  %v559_v61 = vmax.f32 %v407_v54, 0.0 }
 0x157   :  { %v413_v60 = vadd.f32 %v412_v59, %v1552_v38  ;;  %v560_v63 = vmax.f32 %v409_v56, 0.0 }
 0x158   :  { %v561_v62 = vmax.f32 %v411_v58, 0.0 }
 0x159   :  { %v562_v0 = vmax.f32 %v413_v60, 0.0 }
 0x15a   :  { %v621_v1 = vpack.c.bf16 %v561_v62, %v559_v61 }
 0x15b   :  { %v622_v2 = vpack.c.bf16 %v562_v0, %v560_v63  ;;  %v416_v3 = vpop.f32.mrb[8].mxu0 }
 0x15c   :  { %v417_v4 = vadd.f32 %v416_v3, %v1548_v37  ;;  %v418_v5 = vpop.f32.mrb[9].mxu0 }
 0x15d   :  { %v419_v6 = vadd.f32 %v418_v5, %v1552_v38  ;;  %v420_v7 = vpop.f32.mrb[10].mxu0  ;;  %897 = vmatprep.mubr.bf16.mxu1 %v622_v2 }
 0x15e   :  { %v421_v8 = vadd.f32 %v420_v7, %v1548_v37  ;;  %v422_v9 = vpop.f32.mrb[11].mxu0  ;;  %898 = vmatmul.mubr.bf16.gmra.mrb[4].mxu1 %v621_v1  ;;  %v563_v11 = vmax.f32 %v417_v4, 0.0 }
 0x15f   :  { %v423_v10 = vadd.f32 %v422_v9, %v1552_v38  ;;  %v564_v13 = vmax.f32 %v419_v6, 0.0 }
 0x160   :  { %v565_v12 = vmax.f32 %v421_v8, 0.0 }
 0x161   :  { %v566_v14 = vmax.f32 %v423_v10, 0.0 }
 0x162   :  { %v623_v15 = vpack.c.bf16 %v565_v12, %v563_v11 }
 0x163   :  { %v624_v16 = vpack.c.bf16 %v566_v14, %v564_v13  ;;  %v426_v17 = vpop.f32.mrb[12].mxu0 }
 0x164   :  { %v427_v18 = vadd.f32 %v426_v17, %v1548_v37  ;;  %v428_v19 = vpop.f32.mrb[13].mxu0 }
 0x165   :  { %v429_v20 = vadd.f32 %v428_v19, %v1552_v38  ;;  %v430_v21 = vpop.f32.mrb[14].mxu0  ;;  %907 = vmatprep.mubr.bf16.mxu1 %v624_v16 }
 0x166   :  { %v431_v22 = vadd.f32 %v430_v21, %v1548_v37  ;;  %v432_v23 = vpop.f32.mrb[15].mxu0  ;;  %908 = vmatmul.mubr.bf16.gmra.mrb[8].mxu1 %v623_v15  ;;  %v567_v25 = vmax.f32 %v427_v18, 0.0 }
 0x167   :  { %v433_v24 = vadd.f32 %v432_v23, %v1552_v38  ;;  %v568_v27 = vmax.f32 %v429_v20, 0.0 }
 0x168   :  { %v569_v26 = vmax.f32 %v431_v22, 0.0 }
 0x169   :  { %v570_v28 = vmax.f32 %v433_v24, 0.0 }
 0x16a   :  { %v625_v29 = vpack.c.bf16 %v569_v26, %v567_v25 }
 0x16b   :  { %v626_v30 = vpack.c.bf16 %v570_v28, %v568_v27  ;;  %v436_v31 = vpop.f32.mrb[16].mxu0 }
 0x16c   :  { %v437_v32 = vadd.f32 %v436_v31, %v1548_v37  ;;  %v438_v35 = vpop.f32.mrb[17].mxu0 }
 0x16d   :  { %v439_v39 = vadd.f32 %v438_v35, %v1552_v38  ;;  %v440_v40 = vpop.f32.mrb[18].mxu0  ;;  %917 = vmatprep.mubr.bf16.mxu1 %v626_v30 }
 0x16e   :  { %v441_v41 = vadd.f32 %v440_v40, %v1548_v37  ;;  %v442_v42 = vpop.f32.mrb[19].mxu0  ;;  %918 = vmatmul.mubr.bf16.gmra.mrb[12].mxu1 %v625_v29  ;;  %v571_v44 = vmax.f32 %v437_v32, 0.0 }
 0x16f   :  { %v443_v43 = vadd.f32 %v442_v42, %v1552_v38  ;;  %v572_v46 = vmax.f32 %v439_v39, 0.0 }
 0x170   :  { %v573_v45 = vmax.f32 %v441_v41, 0.0 }
 0x171   :  { %v574_v47 = vmax.f32 %v443_v43, 0.0 }
 0x172   :  { %v627_v48 = vpack.c.bf16 %v573_v45, %v571_v44 }
 0x173   :  { %v628_v49 = vpack.c.bf16 %v574_v47, %v572_v46  ;;  %v446_v50 = vpop.f32.mrb[20].mxu0 }
 0x174   :  { %v447_v51 = vadd.f32 %v446_v50, %v1548_v37  ;;  %v448_v52 = vpop.f32.mrb[21].mxu0 }
 0x175   :  { %v449_v53 = vadd.f32 %v448_v52, %v1552_v38  ;;  %v450_v54 = vpop.f32.mrb[22].mxu0  ;;  %927 = vmatprep.mubr.bf16.mxu1 %v628_v49 }
 0x176   :  { %v451_v55 = vadd.f32 %v450_v54, %v1548_v37  ;;  %v452_v56 = vpop.f32.mrb[23].mxu0  ;;  %928 = vmatmul.mubr.bf16.gmra.mrb[16].mxu1 %v627_v48  ;;  %v575_v58 = vmax.f32 %v447_v51, 0.0 }
 0x177   :  { %v453_v57 = vadd.f32 %v452_v56, %v1552_v38  ;;  %v576_v60 = vmax.f32 %v449_v53, 0.0 }
 0x178   :  { %v577_v59 = vmax.f32 %v451_v55, 0.0 }
 0x179   :  { %v578_v61 = vmax.f32 %v453_v57, 0.0 }
 0x17a   :  { %v629_v62 = vpack.c.bf16 %v577_v59, %v575_v58 }
 0x17b   :  { %v630_v63 = vpack.c.bf16 %v578_v61, %v576_v60  ;;  %v456_v0 = vpop.f32.mrb[24].mxu0 }
 0x17c   :  { %v457_v1 = vadd.f32 %v456_v0, %v1548_v37  ;;  %v458_v2 = vpop.f32.mrb[25].mxu0 }
 0x17d   :  { %v459_v3 = vadd.f32 %v458_v2, %v1552_v38  ;;  %v460_v4 = vpop.f32.mrb[26].mxu0  ;;  %937 = vmatprep.mubr.bf16.mxu1 %v630_v63 }
 0x17e   :  { %v461_v5 = vadd.f32 %v460_v4, %v1548_v37  ;;  %v462_v6 = vpop.f32.mrb[27].mxu0  ;;  %938 = vmatmul.mubr.bf16.gmra.mrb[20].mxu1 %v629_v62  ;;  %v579_v8 = vmax.f32 %v457_v1, 0.0 }
 0x17f   :  { %v463_v7 = vadd.f32 %v462_v6, %v1552_v38  ;;  %v580_v10 = vmax.f32 %v459_v3, 0.0 }
 0x180   :  { %v581_v9 = vmax.f32 %v461_v5, 0.0 }
 0x181   :  { %v582_v11 = vmax.f32 %v463_v7, 0.0 }
 0x182   :  { %v631_v12 = vpack.c.bf16 %v581_v9, %v579_v8 }
 0x183   :  { %v632_v13 = vpack.c.bf16 %v582_v11, %v580_v10  ;;  %v466_v14 = vpop.f32.mrb[28].mxu0 }
 0x184   :  { %v467_v15 = vadd.f32 %v466_v14, %v1548_v37  ;;  %v468_v16 = vpop.f32.mrb[29].mxu0 }
 0x185   :  { %v469_v17 = vadd.f32 %v468_v16, %v1552_v38  ;;  %v470_v18 = vpop.f32.mrb[30].mxu0  ;;  %947 = vmatprep.mubr.bf16.mxu1 %v632_v13 }
 0x186   :  { %v471_v19 = vadd.f32 %v470_v18, %v1548_v37  ;;  %v472_v20 = vpop.f32.mrb[31].mxu0  ;;  %948 = vmatmul.mubr.bf16.gmra.mrb[24].mxu1 %v631_v12  ;;  %v583_v22 = vmax.f32 %v467_v15, 0.0 }
 0x187   :  { %v473_v21 = vadd.f32 %v472_v20, %v1552_v38  ;;  %v584_v24 = vmax.f32 %v469_v17, 0.0 }
 0x188   :  { %v585_v23 = vmax.f32 %v471_v19, 0.0 }
 0x189   :  { %v586_v25 = vmax.f32 %v473_v21, 0.0 }
 0x18a   :  { %v633_v26 = vpack.c.bf16 %v585_v23, %v583_v22 }
 0x18b   :  { %v634_v27 = vpack.c.bf16 %v586_v25, %v584_v24  ;;  %v476_v28 = vpop.f32.mrb[32].mxu0 }
 0x18c   :  { %v477_v29 = vadd.f32 %v476_v28, %v1548_v37  ;;  %v478_v30 = vpop.f32.mrb[33].mxu0 }
 0x18d   :  { %v479_v31 = vadd.f32 %v478_v30, %v1552_v38  ;;  %v480_v32 = vpop.f32.mrb[34].mxu0  ;;  %957 = vmatprep.mubr.bf16.mxu1 %v634_v27 }
 0x18e   :  { %v481_v35 = vadd.f32 %v480_v32, %v1548_v37  ;;  %v482_v39 = vpop.f32.mrb[35].mxu0  ;;  %958 = vmatmul.mubr.bf16.gmra.mrb[28].mxu1 %v633_v26  ;;  %v587_v41 = vmax.f32 %v477_v29, 0.0 }
 0x18f   :  { %v483_v40 = vadd.f32 %v482_v39, %v1552_v38  ;;  %v588_v43 = vmax.f32 %v479_v31, 0.0 }
 0x190   :  { %v589_v42 = vmax.f32 %v481_v35, 0.0 }
 0x191   :  { %v590_v44 = vmax.f32 %v483_v40, 0.0 }
 0x192   :  { %v635_v45 = vpack.c.bf16 %v589_v42, %v587_v41 }
 0x193   :  { %v636_v46 = vpack.c.bf16 %v590_v44, %v588_v43  ;;  %v486_v47 = vpop.f32.mrb[36].mxu0 }
 0x194   :  { %v487_v48 = vadd.f32 %v486_v47, %v1548_v37  ;;  %v488_v49 = vpop.f32.mrb[37].mxu0 }
 0x195   :  { %v489_v50 = vadd.f32 %v488_v49, %v1552_v38  ;;  %v490_v51 = vpop.f32.mrb[38].mxu0  ;;  %967 = vmatprep.mubr.bf16.mxu1 %v636_v46 }
 0x196   :  { %v491_v52 = vadd.f32 %v490_v51, %v1548_v37  ;;  %v492_v53 = vpop.f32.mrb[39].mxu0  ;;  %968 = vmatmul.mubr.bf16.gmra.mrb[32].mxu1 %v635_v45  ;;  %v591_v55 = vmax.f32 %v487_v48, 0.0 }
 0x197   :  { %v493_v54 = vadd.f32 %v492_v53, %v1552_v38  ;;  %v592_v57 = vmax.f32 %v489_v50, 0.0 }
 0x198   :  { %v593_v56 = vmax.f32 %v491_v52, 0.0 }
 0x199   :  { %v594_v58 = vmax.f32 %v493_v54, 0.0 }
 0x19a   :  { %v637_v59 = vpack.c.bf16 %v593_v56, %v591_v55 }
 0x19b   :  { %v638_v60 = vpack.c.bf16 %v594_v58, %v592_v57  ;;  %v496_v61 = vpop.f32.mrb[40].mxu0 }
 0x19c   :  { %v497_v62 = vadd.f32 %v496_v61, %v1548_v37  ;;  %v498_v63 = vpop.f32.mrb[41].mxu0 }
 0x19d   :  { %v499_v0 = vadd.f32 %v498_v63, %v1552_v38  ;;  %v500_v1 = vpop.f32.mrb[42].mxu0  ;;  %977 = vmatprep.mubr.bf16.mxu1 %v638_v60 }
 0x19e   :  { %v501_v2 = vadd.f32 %v500_v1, %v1548_v37  ;;  %v502_v3 = vpop.f32.mrb[43].mxu0  ;;  %978 = vmatmul.mubr.bf16.gmra.mrb[36].mxu1 %v637_v59  ;;  %v595_v5 = vmax.f32 %v497_v62, 0.0 }
 0x19f   :  { %v503_v4 = vadd.f32 %v502_v3, %v1552_v38  ;;  %v596_v7 = vmax.f32 %v499_v0, 0.0 }
 0x1a0   :  { %v597_v6 = vmax.f32 %v501_v2, 0.0 }
 0x1a1   :  { %v598_v8 = vmax.f32 %v503_v4, 0.0 }
 0x1a2   :  { %v639_v9 = vpack.c.bf16 %v597_v6, %v595_v5 }
 0x1a3   :  { %v640_v10 = vpack.c.bf16 %v598_v8, %v596_v7  ;;  %v506_v11 = vpop.f32.mrb[44].mxu0 }
 0x1a4   :  { %v507_v12 = vadd.f32 %v506_v11, %v1548_v37  ;;  %v508_v13 = vpop.f32.mrb[45].mxu0 }
 0x1a5   :  { %v509_v14 = vadd.f32 %v508_v13, %v1552_v38  ;;  %v510_v15 = vpop.f32.mrb[46].mxu0  ;;  %987 = vmatprep.mubr.bf16.mxu1 %v640_v10 }
 0x1a6   :  { %v511_v16 = vadd.f32 %v510_v15, %v1548_v37  ;;  %v512_v17 = vpop.f32.mrb[47].mxu0  ;;  %988 = vmatmul.mubr.bf16.gmra.mrb[40].mxu1 %v639_v9  ;;  %v599_v19 = vmax.f32 %v507_v12, 0.0 }
 0x1a7   :  { %v513_v18 = vadd.f32 %v512_v17, %v1552_v38  ;;  %v600_v21 = vmax.f32 %v509_v14, 0.0 }
 0x1a8   :  { %v601_v20 = vmax.f32 %v511_v16, 0.0 }
 0x1a9   :  { %v602_v22 = vmax.f32 %v513_v18, 0.0 }
 0x1aa   :  { %v641_v23 = vpack.c.bf16 %v601_v20, %v599_v19 }
 0x1ab   :  { %v642_v24 = vpack.c.bf16 %v602_v22, %v600_v21  ;;  %v516_v25 = vpop.f32.mrb[48].mxu0  ;;  %v683_v22 = vld [vmem:[%s1712_s4] sm:$0x3]  ;;  %s1463_s4 = smov [#allocation8]  }
 0x1ac   :  { %v517_v26 = vadd.f32 %v516_v25, %v1548_v37  ;;  %v518_v27 = vpop.f32.mrb[49].mxu0  ;;  %s1181_s8 = sshll.u32 %s1463_s4, 4  ;;  %s1182_s8 = int_to_ptr.vmem [resolvable:$true] %s1181_s8 }
 0x1ad   :  { %v519_v28 = vadd.f32 %v518_v27, %v1552_v38  ;;  %v520_v29 = vpop.f32.mrb[50].mxu0  ;;  %997 = vmatprep.mubr.bf16.mxu1 %v642_v24  ;;  %s1428_s9 = scalar_lea.vmem %s1182_s8, 8192  ;;  %p1433_p11 = scmp.lt.s32.totalorder %s1182_s8, %s1182_s8 }
 0x1ae   :  { %v521_v30 = vadd.f32 %v520_v29, %v1548_v37  ;;  %v522_v31 = vpop.f32.mrb[51].mxu0  ;;  %998 = vmatmul.mubr.bf16.gmra.mrb[44].mxu1 %v641_v23  ;;  %v603_v35 = vmax.f32 %v517_v26, 0.0  ;;  %v1623_v23 = vrot.slane %v683_v22, %v194_v34  ;;  %p1429_p10 = scmp.ne.s32.totalorder %s1182_s8, %s1428_s9  ;;  %p1434_p12 = scmp.lt.s32.totalorder %s1428_s9, %s1428_s9 }
 0x1af   :  { %v523_v32 = vadd.f32 %v522_v31, %v1552_v38  ;;  %v604_v40 = vmax.f32 %v519_v28, 0.0 }
 0x1b0   :  { %v605_v39 = vmax.f32 %v521_v30, 0.0  ;;  %p1435_p13 = por %p1434_p12, %p1433_p11 }
 0x1b1   :  { %v606_v41 = vmax.f32 %v523_v32, 0.0 }
 0x1b2   :  { %v643_v42 = vpack.c.bf16 %v605_v39, %v603_v35  ;;  %p1436_p0 = pnand %p1435_p13, %p1429_p10 }
 0x1b3   :  { %v644_v43 = vpack.c.bf16 %v606_v41, %v604_v40  ;;  %v526_v44 = vpop.f32.mrb[52].mxu0 }
 0x1b4   :  { %v527_v45 = vadd.f32 %v526_v44, %v1548_v37  ;;  %v528_v46 = vpop.f32.mrb[53].mxu0 }
 0x1b5   :  { %v529_v47 = vadd.f32 %v528_v46, %v1552_v38  ;;  %v530_v48 = vpop.f32.mrb[54].mxu0  ;;  %1007 = vmatprep.mubr.bf16.mxu1 %v644_v43 }
 0x1b6   :  { %v531_v49 = vadd.f32 %v530_v48, %v1548_v37  ;;  %v532_v50 = vpop.f32.mrb[55].mxu0  ;;  %1008 = vmatmul.mubr.bf16.gmra.mrb[48].mxu1 %v643_v42  ;;  %v607_v52 = vmax.f32 %v527_v45, 0.0 }
 0x1b7   :  { %v533_v51 = vadd.f32 %v532_v50, %v1552_v38  ;;  %v608_v54 = vmax.f32 %v529_v47, 0.0 }
 0x1b8   :  { %v609_v53 = vmax.f32 %v531_v49, 0.0 }
 0x1b9   :  { %v610_v55 = vmax.f32 %v533_v51, 0.0 }
 0x1ba   :  { %v645_v56 = vpack.c.bf16 %v609_v53, %v607_v52 }
 0x1bb   :  { %v646_v57 = vpack.c.bf16 %v610_v55, %v608_v54  ;;  %v536_v58 = vpop.f32.mrb[56].mxu0 }
 0x1bc   :  { %v537_v59 = vadd.f32 %v536_v58, %v1548_v37  ;;  %v538_v60 = vpop.f32.mrb[57].mxu0 }
 0x1bd   :  { %v539_v61 = vadd.f32 %v538_v60, %v1552_v38  ;;  %v540_v62 = vpop.f32.mrb[58].mxu0  ;;  %1017 = vmatprep.mubr.bf16.mxu1 %v646_v57 }
 0x1be   :  { %v541_v63 = vadd.f32 %v540_v62, %v1548_v37  ;;  %v542_v0 = vpop.f32.mrb[59].mxu0  ;;  %1018 = vmatmul.mubr.bf16.gmra.mrb[52].mxu1 %v645_v56  ;;  %v611_v2 = vmax.f32 %v537_v59, 0.0 }
 0x1bf   :  { %v543_v1 = vadd.f32 %v542_v0, %v1552_v38  ;;  %v612_v4 = vmax.f32 %v539_v61, 0.0 }
 0x1c0   :  { %v613_v3 = vmax.f32 %v541_v63, 0.0 }
 0x1c1   :  { %v614_v5 = vmax.f32 %v543_v1, 0.0 }
 0x1c2   :  { %v647_v6 = vpack.c.bf16 %v613_v3, %v611_v2 }
 0x1c3   :  { %v648_v7 = vpack.c.bf16 %v614_v5, %v612_v4  ;;  %v546_v8 = vpop.f32.mrb[60].mxu0 }
 0x1c4   :  { %v547_v9 = vadd.f32 %v546_v8, %v1548_v37  ;;  %v548_v10 = vpop.f32.mrb[61].mxu0 }
 0x1c5   :  { %v549_v11 = vadd.f32 %v548_v10, %v1552_v38  ;;  %v550_v12 = vpop.f32.mrb[62].mxu0  ;;  %1027 = vmatprep.mubr.bf16.mxu1 %v648_v7 }
 0x1c6   :  { %v551_v13 = vadd.f32 %v550_v12, %v1548_v37  ;;  %v552_v14 = vpop.f32.mrb[63].mxu0  ;;  %1028 = vmatmul.mubr.bf16.gmra.mrb[56].mxu1 %v647_v6  ;;  %v615_v16 = vmax.f32 %v547_v9, 0.0  ;;  %v1627_v37 = vrot.slane %v683_v22, %v198_v36 }
 0x1c7   :  { %v553_v15 = vadd.f32 %v552_v14, %v1552_v38  ;;  %v616_v18 = vmax.f32 %v549_v11, 0.0 }
 0x1c8   :  { %v617_v17 = vmax.f32 %v551_v13, 0.0 }
 0x1c9   :  { %v618_v19 = vmax.f32 %v553_v15, 0.0 }
 0x1ca   :  { %v649_v20 = vpack.c.bf16 %v617_v17, %v615_v16 }
 0x1cb   :  { %v650_v21 = vpack.c.bf16 %v618_v19, %v616_v18 }
 0x1cd   :  { %1037 = vmatprep.mubr.bf16.mxu1 %v650_v21 }
 0x1ce   :  { %1038 = vmatmul.mubr.bf16.gmra.mrb[60].mxu1 %v649_v20 }
 0x229   :  { %v889_v38 = vpop.f32.mrb[0].mxu1 }
 0x22a   :  { %v890_v24 = vadd.f32 %v889_v38, %v1623_v23  ;;  %v891_v25 = vpop.f32.mrb[1].mxu1 }
 0x22b   :  { %v892_v26 = vadd.f32 %v891_v25, %v1627_v37  ;;  %v893_v27 = vpop.f32.mrb[2].mxu1 }
 0x22c   :  { %v1048_v28 = vmul.f32 2.0, %v890_v24  ;;  %v894_v29 = vadd.f32 %v893_v27, %v1623_v23  ;;  %v895_v30 = vpop.f32.mrb[3].mxu1 }
 0x22d   :  { %v1049_v31 = vmul.f32 2.0, %v892_v26  ;;  %v896_v32 = vadd.f32 %v895_v30, %v1627_v37 }
 0x22e   :  { %1112 = vst [vmem:[#allocation8] sm:$0xff] %v1048_v28  ;;  %v1050_v34 = vmul.f32 2.0, %v894_v29 }
 0x22f   :  { %1113 = vst [vmem:[#allocation8 + $0x8] sm:$0xff] %v1049_v31  ;;  %v1051_v33 = vmul.f32 2.0, %v896_v32 }
 0x230   :  { %1114 = vst [vmem:[#allocation8 + $0x10] sm:$0xff] %v1050_v34 }
 0x231   :  { %1115 = vst [vmem:[#allocation8 + $0x18] sm:$0xff] %v1051_v33  ;;  %v899_v36 = vpop.f32.mrb[4].mxu1 }
 0x232   :  { %v900_v35 = vadd.f32 %v899_v36, %v1623_v23  ;;  %v901_v39 = vpop.f32.mrb[5].mxu1 }
 0x233   :  { %v902_v40 = vadd.f32 %v901_v39, %v1627_v37  ;;  %v903_v41 = vpop.f32.mrb[6].mxu1 }
 0x234   :  { %v1052_v42 = vmul.f32 2.0, %v900_v35  ;;  %v904_v43 = vadd.f32 %v903_v41, %v1623_v23  ;;  %v905_v44 = vpop.f32.mrb[7].mxu1 }
 0x235   :  { %v1053_v45 = vmul.f32 2.0, %v902_v40  ;;  %v906_v46 = vadd.f32 %v905_v44, %v1627_v37 }
 0x236   :  { %1116 = vst [vmem:[#allocation8 + $0x20] sm:$0xff] %v1052_v42  ;;  %v1054_v47 = vmul.f32 2.0, %v904_v43 }
 0x237   :  { %1117 = vst [vmem:[#allocation8 + $0x28] sm:$0xff] %v1053_v45  ;;  %v1055_v48 = vmul.f32 2.0, %v906_v46 }
 0x238   :  { %1118 = vst [vmem:[#allocation8 + $0x30] sm:$0xff] %v1054_v47 }
 0x239   :  { %1119 = vst [vmem:[#allocation8 + $0x38] sm:$0xff] %v1055_v48  ;;  %v909_v49 = vpop.f32.mrb[8].mxu1 }
 0x23a   :  { %v910_v50 = vadd.f32 %v909_v49, %v1623_v23  ;;  %v911_v51 = vpop.f32.mrb[9].mxu1 }
 0x23b   :  { %v912_v52 = vadd.f32 %v911_v51, %v1627_v37  ;;  %v913_v53 = vpop.f32.mrb[10].mxu1 }
 0x23c   :  { %v1056_v54 = vmul.f32 2.0, %v910_v50  ;;  %v914_v55 = vadd.f32 %v913_v53, %v1623_v23  ;;  %v915_v56 = vpop.f32.mrb[11].mxu1 }
 0x23d   :  { %v1057_v57 = vmul.f32 2.0, %v912_v52  ;;  %v916_v58 = vadd.f32 %v915_v56, %v1627_v37 }
 0x23e   :  { %1120 = vst [vmem:[#allocation8 + $0x40] sm:$0xff] %v1056_v54  ;;  %v1058_v59 = vmul.f32 2.0, %v914_v55 }
 0x23f   :  { %1121 = vst [vmem:[#allocation8 + $0x48] sm:$0xff] %v1057_v57  ;;  %v1059_v60 = vmul.f32 2.0, %v916_v58 }
 0x240   :  { %1122 = vst [vmem:[#allocation8 + $0x50] sm:$0xff] %v1058_v59 }
 0x241   :  { %1123 = vst [vmem:[#allocation8 + $0x58] sm:$0xff] %v1059_v60  ;;  %v919_v61 = vpop.f32.mrb[12].mxu1 }
 0x242   :  { %v920_v62 = vadd.f32 %v919_v61, %v1623_v23  ;;  %v921_v63 = vpop.f32.mrb[13].mxu1 }
 0x243   :  { %v922_v0 = vadd.f32 %v921_v63, %v1627_v37  ;;  %v923_v1 = vpop.f32.mrb[14].mxu1 }
 0x244   :  { %v1060_v2 = vmul.f32 2.0, %v920_v62  ;;  %v924_v3 = vadd.f32 %v923_v1, %v1623_v23  ;;  %v925_v4 = vpop.f32.mrb[15].mxu1 }
 0x245   :  { %v1061_v5 = vmul.f32 2.0, %v922_v0  ;;  %v926_v6 = vadd.f32 %v925_v4, %v1627_v37 }
 0x246   :  { %1124 = vst [vmem:[#allocation8 + $0x60] sm:$0xff] %v1060_v2  ;;  %v1062_v7 = vmul.f32 2.0, %v924_v3 }
 0x247   :  { %1125 = vst [vmem:[#allocation8 + $0x68] sm:$0xff] %v1061_v5  ;;  %v1063_v8 = vmul.f32 2.0, %v926_v6 }
 0x248   :  { %1126 = vst [vmem:[#allocation8 + $0x70] sm:$0xff] %v1062_v7 }
 0x249   :  { %1127 = vst [vmem:[#allocation8 + $0x78] sm:$0xff] %v1063_v8  ;;  %v929_v9 = vpop.f32.mrb[16].mxu1 }
 0x24a   :  { %v930_v10 = vadd.f32 %v929_v9, %v1623_v23  ;;  %v931_v11 = vpop.f32.mrb[17].mxu1 }
 0x24b   :  { %v932_v12 = vadd.f32 %v931_v11, %v1627_v37  ;;  %v933_v13 = vpop.f32.mrb[18].mxu1 }
 0x24c   :  { %v1064_v14 = vmul.f32 2.0, %v930_v10  ;;  %v934_v15 = vadd.f32 %v933_v13, %v1623_v23  ;;  %v935_v16 = vpop.f32.mrb[19].mxu1 }
 0x24d   :  { %v1065_v17 = vmul.f32 2.0, %v932_v12  ;;  %v936_v18 = vadd.f32 %v935_v16, %v1627_v37 }
 0x24e   :  { %1128 = vst [vmem:[#allocation8 + $0x80] sm:$0xff] %v1064_v14  ;;  %v1066_v19 = vmul.f32 2.0, %v934_v15 }
 0x24f   :  { %1129 = vst [vmem:[#allocation8 + $0x88] sm:$0xff] %v1065_v17  ;;  %v1067_v20 = vmul.f32 2.0, %v936_v18 }
 0x250   :  { %1130 = vst [vmem:[#allocation8 + $0x90] sm:$0xff] %v1066_v19 }
 0x251   :  { %1131 = vst [vmem:[#allocation8 + $0x98] sm:$0xff] %v1067_v20  ;;  %v939_v21 = vpop.f32.mrb[20].mxu1 }
 0x252   :  { %v940_v22 = vadd.f32 %v939_v21, %v1623_v23  ;;  %v941_v38 = vpop.f32.mrb[21].mxu1 }
 0x253   :  { %v942_v24 = vadd.f32 %v941_v38, %v1627_v37  ;;  %v943_v25 = vpop.f32.mrb[22].mxu1 }
 0x254   :  { %v1068_v26 = vmul.f32 2.0, %v940_v22  ;;  %v944_v27 = vadd.f32 %v943_v25, %v1623_v23  ;;  %v945_v28 = vpop.f32.mrb[23].mxu1 }
 0x255   :  { %v1069_v29 = vmul.f32 2.0, %v942_v24  ;;  %v946_v30 = vadd.f32 %v945_v28, %v1627_v37 }
 0x256   :  { %1132 = vst [vmem:[#allocation8 + $0xa0] sm:$0xff] %v1068_v26  ;;  %v1070_v31 = vmul.f32 2.0, %v944_v27 }
 0x257   :  { %1133 = vst [vmem:[#allocation8 + $0xa8] sm:$0xff] %v1069_v29  ;;  %v1071_v32 = vmul.f32 2.0, %v946_v30 }
 0x258   :  { %1134 = vst [vmem:[#allocation8 + $0xb0] sm:$0xff] %v1070_v31 }
 0x259   :  { %1135 = vst [vmem:[#allocation8 + $0xb8] sm:$0xff] %v1071_v32  ;;  %v949_v34 = vpop.f32.mrb[24].mxu1 }
 0x25a   :  { %v950_v33 = vadd.f32 %v949_v34, %v1623_v23  ;;  %v951_v36 = vpop.f32.mrb[25].mxu1 }
 0x25b   :  { %v952_v35 = vadd.f32 %v951_v36, %v1627_v37  ;;  %v953_v39 = vpop.f32.mrb[26].mxu1 }
 0x25c   :  { %v1072_v40 = vmul.f32 2.0, %v950_v33  ;;  %v954_v41 = vadd.f32 %v953_v39, %v1623_v23  ;;  %v955_v42 = vpop.f32.mrb[27].mxu1 }
 0x25d   :  { %v1073_v43 = vmul.f32 2.0, %v952_v35  ;;  %v956_v44 = vadd.f32 %v955_v42, %v1627_v37 }
 0x25e   :  { %1136 = vst [vmem:[#allocation8 + $0xc0] sm:$0xff] %v1072_v40  ;;  %v1074_v45 = vmul.f32 2.0, %v954_v41 }
 0x25f   :  { %1137 = vst [vmem:[#allocation8 + $0xc8] sm:$0xff] %v1073_v43  ;;  %v1075_v46 = vmul.f32 2.0, %v956_v44 }
 0x260   :  { %1138 = vst [vmem:[#allocation8 + $0xd0] sm:$0xff] %v1074_v45 }
 0x261   :  { %1139 = vst [vmem:[#allocation8 + $0xd8] sm:$0xff] %v1075_v46  ;;  %v959_v47 = vpop.f32.mrb[28].mxu1 }
 0x262   :  { %v960_v48 = vadd.f32 %v959_v47, %v1623_v23  ;;  %v961_v49 = vpop.f32.mrb[29].mxu1 }
 0x263   :  { %v962_v50 = vadd.f32 %v961_v49, %v1627_v37  ;;  %v963_v51 = vpop.f32.mrb[30].mxu1 }
 0x264   :  { %v1076_v52 = vmul.f32 2.0, %v960_v48  ;;  %v964_v53 = vadd.f32 %v963_v51, %v1623_v23  ;;  %v965_v54 = vpop.f32.mrb[31].mxu1 }
 0x265   :  { %v1077_v55 = vmul.f32 2.0, %v962_v50  ;;  %v966_v56 = vadd.f32 %v965_v54, %v1627_v37 }
 0x266   :  { %1140 = vst [vmem:[#allocation8 + $0xe0] sm:$0xff] %v1076_v52  ;;  %v1078_v57 = vmul.f32 2.0, %v964_v53 }
 0x267   :  { %1141 = vst [vmem:[#allocation8 + $0xe8] sm:$0xff] %v1077_v55  ;;  %v1079_v58 = vmul.f32 2.0, %v966_v56 }
 0x268   :  { %1142 = vst [vmem:[#allocation8 + $0xf0] sm:$0xff] %v1078_v57 }
 0x269   :  { %1143 = vst [vmem:[#allocation8 + $0xf8] sm:$0xff] %v1079_v58  ;;  %v969_v59 = vpop.f32.mrb[32].mxu1 }
 0x26a   :  { %v970_v60 = vadd.f32 %v969_v59, %v1623_v23  ;;  %v971_v61 = vpop.f32.mrb[33].mxu1 }
 0x26b   :  { %v972_v62 = vadd.f32 %v971_v61, %v1627_v37  ;;  %v973_v63 = vpop.f32.mrb[34].mxu1 }
 0x26c   :  { %v1080_v0 = vmul.f32 2.0, %v970_v60  ;;  %v974_v1 = vadd.f32 %v973_v63, %v1623_v23  ;;  %v975_v2 = vpop.f32.mrb[35].mxu1 }
 0x26d   :  { %v1081_v3 = vmul.f32 2.0, %v972_v62  ;;  %v976_v4 = vadd.f32 %v975_v2, %v1627_v37 }
 0x26e   :  { %1144 = vst [vmem:[#allocation8 + $0x100] sm:$0xff] %v1080_v0  ;;  %v1082_v5 = vmul.f32 2.0, %v974_v1 }
 0x26f   :  { %1145 = vst [vmem:[#allocation8 + $0x108] sm:$0xff] %v1081_v3  ;;  %v1083_v6 = vmul.f32 2.0, %v976_v4 }
 0x270   :  { %1146 = vst [vmem:[#allocation8 + $0x110] sm:$0xff] %v1082_v5 }
 0x271   :  { %1147 = vst [vmem:[#allocation8 + $0x118] sm:$0xff] %v1083_v6  ;;  %v979_v7 = vpop.f32.mrb[36].mxu1 }
 0x272   :  { %v980_v8 = vadd.f32 %v979_v7, %v1623_v23  ;;  %v981_v9 = vpop.f32.mrb[37].mxu1 }
 0x273   :  { %v982_v10 = vadd.f32 %v981_v9, %v1627_v37  ;;  %v983_v11 = vpop.f32.mrb[38].mxu1 }
 0x274   :  { %v1084_v12 = vmul.f32 2.0, %v980_v8  ;;  %v984_v13 = vadd.f32 %v983_v11, %v1623_v23  ;;  %v985_v14 = vpop.f32.mrb[39].mxu1 }
 0x275   :  { %v1085_v15 = vmul.f32 2.0, %v982_v10  ;;  %v986_v16 = vadd.f32 %v985_v14, %v1627_v37 }
 0x276   :  { %1148 = vst [vmem:[#allocation8 + $0x120] sm:$0xff] %v1084_v12  ;;  %v1086_v17 = vmul.f32 2.0, %v984_v13 }
 0x277   :  { %1149 = vst [vmem:[#allocation8 + $0x128] sm:$0xff] %v1085_v15  ;;  %v1087_v18 = vmul.f32 2.0, %v986_v16 }
 0x278   :  { %1150 = vst [vmem:[#allocation8 + $0x130] sm:$0xff] %v1086_v17 }
 0x279   :  { %1151 = vst [vmem:[#allocation8 + $0x138] sm:$0xff] %v1087_v18  ;;  %v989_v19 = vpop.f32.mrb[40].mxu1 }
 0x27a   :  { %v990_v20 = vadd.f32 %v989_v19, %v1623_v23  ;;  %v991_v21 = vpop.f32.mrb[41].mxu1 }
 0x27b   :  { %v992_v22 = vadd.f32 %v991_v21, %v1627_v37  ;;  %v993_v38 = vpop.f32.mrb[42].mxu1 }
 0x27c   :  { %v1088_v24 = vmul.f32 2.0, %v990_v20  ;;  %v994_v25 = vadd.f32 %v993_v38, %v1623_v23  ;;  %v995_v26 = vpop.f32.mrb[43].mxu1 }
 0x27d   :  { %v1089_v27 = vmul.f32 2.0, %v992_v22  ;;  %v996_v28 = vadd.f32 %v995_v26, %v1627_v37 }
 0x27e   :  { %1152 = vst [vmem:[#allocation8 + $0x140] sm:$0xff] %v1088_v24  ;;  %v1090_v29 = vmul.f32 2.0, %v994_v25 }
 0x27f   :  { %1153 = vst [vmem:[#allocation8 + $0x148] sm:$0xff] %v1089_v27  ;;  %v1091_v30 = vmul.f32 2.0, %v996_v28 }
 0x280   :  { %1154 = vst [vmem:[#allocation8 + $0x150] sm:$0xff] %v1090_v29 }
 0x281   :  { %1155 = vst [vmem:[#allocation8 + $0x158] sm:$0xff] %v1091_v30  ;;  %v999_v31 = vpop.f32.mrb[44].mxu1 }
 0x282   :  { %v1000_v32 = vadd.f32 %v999_v31, %v1623_v23  ;;  %v1001_v34 = vpop.f32.mrb[45].mxu1 }
 0x283   :  { %v1002_v33 = vadd.f32 %v1001_v34, %v1627_v37  ;;  %v1003_v36 = vpop.f32.mrb[46].mxu1 }
 0x284   :  { %v1092_v35 = vmul.f32 2.0, %v1000_v32  ;;  %v1004_v39 = vadd.f32 %v1003_v36, %v1623_v23  ;;  %v1005_v40 = vpop.f32.mrb[47].mxu1 }
 0x285   :  { %v1093_v41 = vmul.f32 2.0, %v1002_v33  ;;  %v1006_v42 = vadd.f32 %v1005_v40, %v1627_v37 }
 0x286   :  { %1156 = vst [vmem:[#allocation8 + $0x160] sm:$0xff] %v1092_v35  ;;  %v1094_v43 = vmul.f32 2.0, %v1004_v39 }
 0x287   :  { %1157 = vst [vmem:[#allocation8 + $0x168] sm:$0xff] %v1093_v41  ;;  %v1095_v44 = vmul.f32 2.0, %v1006_v42 }
 0x288   :  { %1158 = vst [vmem:[#allocation8 + $0x170] sm:$0xff] %v1094_v43 }
 0x289   :  { %1159 = vst [vmem:[#allocation8 + $0x178] sm:$0xff] %v1095_v44  ;;  %v1009_v45 = vpop.f32.mrb[48].mxu1 }
 0x28a   :  { %v1010_v46 = vadd.f32 %v1009_v45, %v1623_v23  ;;  %v1011_v47 = vpop.f32.mrb[49].mxu1 }
 0x28b   :  { %v1012_v48 = vadd.f32 %v1011_v47, %v1627_v37  ;;  %v1013_v49 = vpop.f32.mrb[50].mxu1 }
 0x28c   :  { %v1096_v50 = vmul.f32 2.0, %v1010_v46  ;;  %v1014_v51 = vadd.f32 %v1013_v49, %v1623_v23  ;;  %v1015_v52 = vpop.f32.mrb[51].mxu1 }
 0x28d   :  { %v1097_v53 = vmul.f32 2.0, %v1012_v48  ;;  %v1016_v54 = vadd.f32 %v1015_v52, %v1627_v37 }
 0x28e   :  { %1160 = vst [vmem:[#allocation8 + $0x180] sm:$0xff] %v1096_v50  ;;  %v1098_v55 = vmul.f32 2.0, %v1014_v51 }
 0x28f   :  { %1161 = vst [vmem:[#allocation8 + $0x188] sm:$0xff] %v1097_v53  ;;  %v1099_v56 = vmul.f32 2.0, %v1016_v54 }
 0x290   :  { %1162 = vst [vmem:[#allocation8 + $0x190] sm:$0xff] %v1098_v55 }
 0x291   :  { %1163 = vst [vmem:[#allocation8 + $0x198] sm:$0xff] %v1099_v56  ;;  %v1019_v57 = vpop.f32.mrb[52].mxu1 }
 0x292   :  { %v1020_v58 = vadd.f32 %v1019_v57, %v1623_v23  ;;  %v1021_v59 = vpop.f32.mrb[53].mxu1 }
 0x293   :  { %v1022_v60 = vadd.f32 %v1021_v59, %v1627_v37  ;;  %v1023_v61 = vpop.f32.mrb[54].mxu1 }
 0x294   :  { %v1100_v62 = vmul.f32 2.0, %v1020_v58  ;;  %v1024_v63 = vadd.f32 %v1023_v61, %v1623_v23  ;;  %v1025_v0 = vpop.f32.mrb[55].mxu1 }
 0x295   :  { %v1101_v1 = vmul.f32 2.0, %v1022_v60  ;;  %v1026_v2 = vadd.f32 %v1025_v0, %v1627_v37 }
 0x296   :  { %1164 = vst [vmem:[#allocation8 + $0x1a0] sm:$0xff] %v1100_v62  ;;  %v1102_v3 = vmul.f32 2.0, %v1024_v63 }
 0x297   :  { %1165 = vst [vmem:[#allocation8 + $0x1a8] sm:$0xff] %v1101_v1  ;;  %v1103_v4 = vmul.f32 2.0, %v1026_v2 }
 0x298   :  { %1166 = vst [vmem:[#allocation8 + $0x1b0] sm:$0xff] %v1102_v3 }
 0x299   :  { %1167 = vst [vmem:[#allocation8 + $0x1b8] sm:$0xff] %v1103_v4  ;;  %v1029_v5 = vpop.f32.mrb[56].mxu1 }
 0x29a   :  { %v1030_v6 = vadd.f32 %v1029_v5, %v1623_v23  ;;  %v1031_v7 = vpop.f32.mrb[57].mxu1 }
 0x29b   :  { %v1032_v8 = vadd.f32 %v1031_v7, %v1627_v37  ;;  %v1033_v9 = vpop.f32.mrb[58].mxu1 }
 0x29c   :  { %v1104_v10 = vmul.f32 2.0, %v1030_v6  ;;  %v1034_v11 = vadd.f32 %v1033_v9, %v1623_v23  ;;  %v1035_v12 = vpop.f32.mrb[59].mxu1 }
 0x29d   :  { %v1105_v13 = vmul.f32 2.0, %v1032_v8  ;;  %v1036_v14 = vadd.f32 %v1035_v12, %v1627_v37 }
 0x29e   :  { %1168 = vst [vmem:[#allocation8 + $0x1c0] sm:$0xff] %v1104_v10  ;;  %v1106_v15 = vmul.f32 2.0, %v1034_v11 }
 0x29f   :  { %1169 = vst [vmem:[#allocation8 + $0x1c8] sm:$0xff] %v1105_v13  ;;  %v1107_v16 = vmul.f32 2.0, %v1036_v14 }
 0x2a0   :  { %1170 = vst [vmem:[#allocation8 + $0x1d0] sm:$0xff] %v1106_v15 }
 0x2a1   :  { %1171 = vst [vmem:[#allocation8 + $0x1d8] sm:$0xff] %v1107_v16  ;;  %v1039_v17 = vpop.f32.mrb[60].mxu1 }
 0x2a2   :  { %v1040_v18 = vadd.f32 %v1039_v17, %v1623_v23  ;;  %v1041_v19 = vpop.f32.mrb[61].mxu1 }
 0x2a3   :  { %v1042_v20 = vadd.f32 %v1041_v19, %v1627_v37  ;;  %v1043_v21 = vpop.f32.mrb[62].mxu1 }
 0x2a4   :  { %v1108_v22 = vmul.f32 2.0, %v1040_v18  ;;  %v1044_v38 = vadd.f32 %v1043_v21, %v1623_v23  ;;  %v1045_v24 = vpop.f32.mrb[63].mxu1 }
 0x2a5   :  { %v1109_v25 = vmul.f32 2.0, %v1042_v20  ;;  %v1046_v26 = vadd.f32 %v1045_v24, %v1627_v37 }
 0x2a6   :  { %1172 = vst [vmem:[#allocation8 + $0x1e0] sm:$0xff] %v1108_v22  ;;  %v1110_v27 = vmul.f32 2.0, %v1044_v38 }
 0x2a7   :  { %1173 = vst [vmem:[#allocation8 + $0x1e8] sm:$0xff] %v1109_v25  ;;  %v1111_v28 = vmul.f32 2.0, %v1046_v26 }
 0x2a8   :  { %1174 = vst [vmem:[#allocation8 + $0x1f0] sm:$0xff] %v1110_v27 }
 0x2a9   :  { %1175 = vst [vmem:[#allocation8 + $0x1f8] sm:$0xff] %v1111_v28 }
 0x2aa   :  { %1439 = shalt.err (!%p1436_p0)
}
 0x2ab   :  { %s1440_s12 = scalar_lea.hbm %s1713_s5, 8192 }
 0x2ac   :  { %p1441_p1 = scmp.ne.s32.totalorder %s1713_s5, %s1440_s12  ;;  %p1444_p2 = scmp.lt.u32.totalorder %s1440_s12, %s1713_s5 }
 0x2ae   :  { %p1446_p3 = pnand %p1444_p2, %p1441_p1 }
 0x2b0   :  { %1449 = shalt.err (!%p1446_p3)
}
 0x2b1   :  { %1187 = dma.vmem_to_hbm [thread:$0]  %s1182_s8, 8192, %s1713_s5, [#allocation4], %s1460_s1, %s1460_s1, %s1461_s17  }
 0x2b2   :  { %1454 = dma.done.wait [#allocation4], 8192  }
 0x2b3   :  { %1455 = vsyncadd [#allocation4], 4294959104 }
 0x2b4   :  { %1191 = vsyncpa [#allocation3], 1 }
 0x2b5   :  { %1192 = vsyncpa [#allocation6], 1 }
 0x2b6   :  { %1193 = vsyncpa [#allocation4], 1 }

// kernel: _ffn_impl.1
= control target key start
LH: loop header
LB: loop body
LE: loop exit
PB: predicated region body
PF: predicated region fallthrough
CT: control target
= control target key end

     0   :  { %10 = vsyncpa [#allocation3], 0  ;;  %s1708_s0 = inlined_call_operand.hbm [shape: f32[256,256], index: 0, kind: input, shape index: {}]   ;;  %s1709_s1 = inlined_call_operand.hbm [shape: bf16[256,256], index: 1, kind: input, shape index: {}]   ;;  %s1710_s2 = inlined_call_operand.vmem [shape: f32[1,256], index: 2, kind: input, shape index: {}]   ;;  %s1711_s3 = inlined_call_operand.hbm [shape: bf16[256,256], index: 3, kind: input, shape index: {}]   ;;  %s1712_s4 = inlined_call_operand.vmem [shape: f32[1,256], index: 4, kind: input, shape index: {}]   ;;  %s1713_s5 = inlined_call_operand.hbm [shape: f32[256,256], index: 5, kind: output, shape index: {}]  }
   0x1   :  { %11 = vsyncpa [#allocation6], 0 }
   0x2   :  { %12 = vsyncpa [#allocation4], 0  ;;  %s1456_s18 = smov [#allocation5]   ;;  %s1362_s22 = scalar_lea.hbm %s1709_s1, 4096 }
   0x3   :  { %s30_s19 = sshll.u32 %s1456_s18, 4  ;;  %p1363_p0 = scmp.ne.s32.totalorder %s1709_s1, %s1362_s22  ;;  %s31_s19 = int_to_ptr.vmem [resolvable:$true] %s30_s19 }
   0x4   :  { %p1366_p1 = scmp.lt.u32.totalorder %s1362_s22, %s1709_s1 }
   0x6   :  { %p1368_p2 = pnand %p1366_p1, %p1363_p0 }
   0x8   :  { %1371 = shalt.err (!%p1368_p2)
}
   0x9   :  { %s1372_s27 = scalar_lea.vmem %s31_s19, 4096  ;;  %p1377_p4 = scmp.lt.s32.totalorder %s31_s19, %s31_s19 }
   0xa   :  { %p1373_p3 = scmp.ne.s32.totalorder %s31_s19, %s1372_s27  ;;  %p1378_p5 = scmp.lt.s32.totalorder %s1372_s27, %s1372_s27 }
   0xc   :  { %p1379_p6 = por %p1378_p5, %p1377_p4 }
   0xe   :  { %p1380_p7 = pnand %p1379_p6, %p1373_p3 }
  0x10   :  { %1383 = shalt.err (!%p1380_p7)
}
  0x11   :  { %s1457_s28 = smov 128   ;;  %s1458_s29 = smov 8  }
  0x12   :  { %36 = dma.hbm_to_vmem [thread:$0]  %s1709_s1, 4096, %s31_s19, [#allocation6], %s1457_s28, %s1457_s28, %s1458_s29  }
  0x13   :  { %s1459_s7 = smov [#allocation2]   ;;  %s1384_s11 = scalar_lea.hbm %s1708_s0, 8192 }
  0x14   :  { %s18_s8 = sshll.u32 %s1459_s7, 4  ;;  %p1385_p8 = scmp.ne.s32.totalorder %s1708_s0, %s1384_s11  ;;  %s19_s8 = int_to_ptr.vmem [resolvable:$true] %s18_s8 }
  0x15   :  { %p1388_p9 = scmp.lt.u32.totalorder %s1384_s11, %s1708_s0 }
  0x17   :  { %p1390_p10 = pnand %p1388_p9, %p1385_p8 }
  0x19   :  { %1393 = shalt.err (!%p1390_p10)
}
  0x1a   :  { %s1394_s16 = scalar_lea.vmem %s19_s8, 8192  ;;  %p1399_p12 = scmp.lt.s32.totalorder %s19_s8, %s19_s8 }
  0x1b   :  { %p1395_p11 = scmp.ne.s32.totalorder %s19_s8, %s1394_s16  ;;  %p1400_p13 = scmp.lt.s32.totalorder %s1394_s16, %s1394_s16 }
  0x1d   :  { %p1401_p0 = por %p1400_p13, %p1399_p12 }
  0x1f   :  { %p1402_p1 = pnand %p1401_p0, %p1395_p11 }
  0x21   :  { %1405 = shalt.err (!%p1402_p1)
}
  0x22   :  { %s1460_s1 = smov 256   ;;  %s1461_s17 = smov 16  }
  0x23   :  { %24 = dma.hbm_to_vmem [thread:$0]  %s1708_s0, 8192, %s19_s8, [#allocation3], %s1460_s1, %s1460_s1, %s1461_s17  }
  0x24   :  { %s1462_s20 = smov [#allocation7]   ;;  %s1406_s24 = scalar_lea.hbm %s1711_s3, 4096 }
  0x25   :  { %s44_s21 = sshll.u32 %s1462_s20, 4  ;;  %p1407_p2 = scmp.ne.s32.totalorder %s1711_s3, %s1406_s24  ;;  %s45_s21 = int_to_ptr.vmem [resolvable:$true] %s44_s21 }
  0x26   :  { %p1410_p3 = scmp.lt.u32.totalorder %s1406_s24, %s1711_s3 }
  0x28   :  { %p1412_p4 = pnand %p1410_p3, %p1407_p2 }
  0x2a   :  { %1415 = shalt.err (!%p1412_p4)
}
  0x2b   :  { %s1416_s6 = scalar_lea.vmem %s45_s21, 4096  ;;  %p1421_p6 = scmp.lt.s32.totalorder %s45_s21, %s45_s21 }
  0x2c   :  { %p1417_p5 = scmp.ne.s32.totalorder %s45_s21, %s1416_s6  ;;  %p1422_p7 = scmp.lt.s32.totalorder %s1416_s6, %s1416_s6 }
  0x2e   :  { %p1423_p8 = por %p1422_p7, %p1421_p6 }
  0x30   :  { %p1424_p9 = pnand %p1423_p8, %p1417_p5 }
  0x32   :  { %1427 = shalt.err (!%p1424_p9)
}
  0x33   :  { %50 = dma.hbm_to_vmem [thread:$0]  %s1711_s3, 4096, %s45_s21, [#allocation6], %s1457_s28, %s1457_s28, %s1458_s29  }
  0x34   :  { %1450 = dma.done.wait [#allocation3], 8192  }
  0x35   :  { %1451 = vsyncadd [#allocation3], 4294959104 }
  0x36   :  { %1452 = dma.done.wait [#allocation6], 8192  }
  0x37   :  { %1453 = vsyncadd [#allocation6], 4294959104  ;;  %v1266_v0 = vld [vmem:[#allocation5 + $0x4] ss:$8 sps:$4 sm:$0xff]   ;;  %v1268_v1 = vld [vmem:[#allocation5] ss:$8 sps:$4 sm:$0xff]  }
  0x38   :  { %362 = vmatprep.subr.bf16.mxu0 %v1266_v0  ;;  %v1269_v2 = vld [vmem:[#allocation5 + $0x14] ss:$8 sps:$4 sm:$0xff]   ;;  %v1271_v3 = vld [vmem:[#allocation5 + $0x10] ss:$8 sps:$4 sm:$0xff]   ;;  %v1272_v4 = vld [vmem:[#allocation5 + $0x24] ss:$8 sps:$4 sm:$0xff]  }
  0x39   :  { %363 = vmatpush1.bf16.msra.mxu0 %v1268_v1  ;;  %v1274_v5 = vld [vmem:[#allocation5 + $0x20] ss:$8 sps:$4 sm:$0xff]   ;;  %v1275_v6 = vld [vmem:[#allocation5 + $0x34] ss:$8 sps:$4 sm:$0xff]   ;;  %v1277_v7 = vld [vmem:[#allocation5 + $0x30] ss:$8 sps:$4 sm:$0xff]  }
  0x3a   :  { %364 = vmatprep.subr.bf16.mxu0 %v1269_v2  ;;  %v1278_v8 = vld [vmem:[#allocation5 + $0x44] ss:$8 sps:$4 sm:$0xff]   ;;  %v1280_v9 = vld [vmem:[#allocation5 + $0x40] ss:$8 sps:$4 sm:$0xff]   ;;  %v1281_v10 = vld [vmem:[#allocation5 + $0x54] ss:$8 sps:$4 sm:$0xff]  }
  0x3b   :  { %v1283_v11 = vld [vmem:[#allocation5 + $0x50] ss:$8 sps:$4 sm:$0xff]   ;;  %v1284_v12 = vld [vmem:[#allocation5 + $0x64] ss:$8 sps:$4 sm:$0xff]   ;;  %v1286_v16 = vld [vmem:[#allocation5 + $0x60] ss:$8 sps:$4 sm:$0xff]  }
  0x3c   :  { %v63_v13 = vld [vmem:[#allocation2 + $0x8] sm:$0xff]  ;;  %v65_v14 = vld [vmem:[#allocation2 + $0x18] sm:$0xff]  ;;  %v62_v38 = vld [vmem:[#allocation2] sm:$0xff] }
  0x3d   :  { %365 = vmatpush1.bf16.msra.mxu0 %v1271_v3  ;;  %v127_v15 = vpack.c.bf16 %v65_v14, %v63_v13  ;;  %v1287_v17 = vld [vmem:[#allocation5 + $0x74] ss:$8 sps:$4 sm:$0xff]   ;;  %v1289_v18 = vld [vmem:[#allocation5 + $0x70] ss:$8 sps:$4 sm:$0xff]   ;;  %v1290_v19 = vld [vmem:[#allocation5 + $0x84] ss:$8 sps:$4 sm:$0xff]  }
  0x3e   :  { %366 = vmatprep.subr.bf16.mxu0 %v1272_v4  ;;  %v1292_v20 = vld [vmem:[#allocation5 + $0x80] ss:$8 sps:$4 sm:$0xff]   ;;  %v1293_v21 = vld [vmem:[#allocation5 + $0x94] ss:$8 sps:$4 sm:$0xff]   ;;  %v1295_v22 = vld [vmem:[#allocation5 + $0x90] ss:$8 sps:$4 sm:$0xff]  }
  0x3f   :  { %394 = vmatprep.mubr.bf16.mxu0 %v127_v15  ;;  %v1296_v23 = vld [vmem:[#allocation5 + $0xa4] ss:$8 sps:$4 sm:$0xff]   ;;  %v1298_v24 = vld [vmem:[#allocation5 + $0xa0] ss:$8 sps:$4 sm:$0xff]   ;;  %v1299_v25 = vld [vmem:[#allocation5 + $0xb4] ss:$8 sps:$4 sm:$0xff]  }
  0x40   :  { %v1301_v26 = vld [vmem:[#allocation5 + $0xb0] ss:$8 sps:$4 sm:$0xff]   ;;  %v1302_v27 = vld [vmem:[#allocation5 + $0xc4] ss:$8 sps:$4 sm:$0xff]   ;;  %v1304_v28 = vld [vmem:[#allocation5 + $0xc0] ss:$8 sps:$4 sm:$0xff]  }
  0x41   :  { %367 = vmatpush1.bf16.msra.mxu0 %v1274_v5  ;;  %v1305_v29 = vld [vmem:[#allocation5 + $0xd4] ss:$8 sps:$4 sm:$0xff]   ;;  %v1307_v30 = vld [vmem:[#allocation5 + $0xd0] ss:$8 sps:$4 sm:$0xff]   ;;  %v1308_v31 = vld [vmem:[#allocation5 + $0xe4] ss:$8 sps:$4 sm:$0xff]  }
  0x42   :  { %368 = vmatprep.subr.bf16.mxu0 %v1275_v6  ;;  %v1310_v32 = vld [vmem:[#allocation5 + $0xe0] ss:$8 sps:$4 sm:$0xff]   ;;  %v1311_v33 = vld [vmem:[#allocation5 + $0xf4] ss:$8 sps:$4 sm:$0xff]   ;;  %v1314_v34 = vld [vmem:[#allocation7 + $0x4] ss:$8 sps:$4 sm:$0xff]  }
  0x43   :  { %v1316_v35 = vld [vmem:[#allocation7] ss:$8 sps:$4 sm:$0xff]   ;;  %v1317_v36 = vld [vmem:[#allocation7 + $0x14] ss:$8 sps:$4 sm:$0xff]   ;;  %v1313_v37 = vld [vmem:[#allocation5 + $0xf0] ss:$8 sps:$4 sm:$0xff]   ;;  %855 = vmatprep.subr.bf16.mxu1 %v1314_v34 }
  0x44   :  { %v64_v39 = vld [vmem:[#allocation2 + $0x10] sm:$0xff]  ;;  %v67_v40 = vld [vmem:[#allocation2 + $0x28] sm:$0xff]  ;;  %v69_v41 = vld [vmem:[#allocation2 + $0x38] sm:$0xff]  ;;  %856 = vmatpush1.bf16.msra.mxu1 %v1316_v35 }
  0x45   :  { %369 = vmatpush1.bf16.msra.mxu0 %v1277_v7  ;;  %v1319_v42 = vld [vmem:[#allocation7 + $0x10] ss:$8 sps:$4 sm:$0xff]   ;;  %v126_v43 = vpack.c.bf16 %v64_v39, %v62_v38  ;;  %857 = vmatprep.subr.bf16.mxu1 %v1317_v36  ;;  %v1320_v44 = vld [vmem:[#allocation7 + $0x24] ss:$8 sps:$4 sm:$0xff]   ;;  %v129_v45 = vpack.c.bf16 %v69_v41, %v67_v40  ;;  %v1322_v46 = vld [vmem:[#allocation7 + $0x20] ss:$8 sps:$4 sm:$0xff]  }
  0x46   :  { %370 = vmatprep.subr.bf16.mxu0 %v1278_v8  ;;  %v1323_v47 = vld [vmem:[#allocation7 + $0x34] ss:$8 sps:$4 sm:$0xff]   ;;  %v66_v48 = vld [vmem:[#allocation2 + $0x20] sm:$0xff]  ;;  %v71_v50 = vld [vmem:[#allocation2 + $0x48] sm:$0xff] }
  0x47   :  { %v68_v49 = vld [vmem:[#allocation2 + $0x30] sm:$0xff]  ;;  %v73_v51 = vld [vmem:[#allocation2 + $0x58] sm:$0xff]  ;;  %v1326_v54 = vld [vmem:[#allocation7 + $0x44] ss:$8 sps:$4 sm:$0xff]  }
  0x48   :  { %858 = vmatpush1.bf16.msra.mxu1 %v1319_v42  ;;  %v1325_v52 = vld [vmem:[#allocation7 + $0x30] ss:$8 sps:$4 sm:$0xff]   ;;  %v128_v53 = vpack.c.bf16 %v68_v49, %v66_v48  ;;  %v131_v55 = vpack.c.bf16 %v73_v51, %v71_v50  ;;  %v1328_v56 = vld [vmem:[#allocation7 + $0x40] ss:$8 sps:$4 sm:$0xff]   ;;  %v1329_v57 = vld [vmem:[#allocation7 + $0x54] ss:$8 sps:$4 sm:$0xff]  }
  0x49   :  { %371 = vmatpush1.bf16.msra.mxu0 %v1280_v9  ;;  %859 = vmatprep.subr.bf16.mxu1 %v1320_v44  ;;  %v70_v58 = vld [vmem:[#allocation2 + $0x40] sm:$0xff]  ;;  %v72_v59 = vld [vmem:[#allocation2 + $0x50] sm:$0xff]  ;;  %v75_v60 = vld [vmem:[#allocation2 + $0x68] sm:$0xff] }
  0x4a   :  { %372 = vmatprep.subr.bf16.mxu0 %v1281_v10  ;;  %v77_v61 = vld [vmem:[#allocation2 + $0x78] sm:$0xff]  ;;  %v130_v63 = vpack.c.bf16 %v72_v59, %v70_v58  ;;  %v1332_v0 = vld [vmem:[#allocation7 + $0x64] ss:$8 sps:$4 sm:$0xff]   ;;  %v1334_v2 = vld [vmem:[#allocation7 + $0x60] ss:$8 sps:$4 sm:$0xff]  }
  0x4b   :  { %v1331_v62 = vld [vmem:[#allocation7 + $0x50] ss:$8 sps:$4 sm:$0xff]   ;;  %v133_v1 = vpack.c.bf16 %v77_v61, %v75_v60  ;;  %v1335_v3 = vld [vmem:[#allocation7 + $0x74] ss:$8 sps:$4 sm:$0xff]   ;;  %v74_v4 = vld [vmem:[#allocation2 + $0x60] sm:$0xff] }
  0x4c   :  { %860 = vmatpush1.bf16.msra.mxu1 %v1322_v46  ;;  %v76_v5 = vld [vmem:[#allocation2 + $0x70] sm:$0xff]  ;;  %v79_v6 = vld [vmem:[#allocation2 + $0x88] sm:$0xff]  ;;  %v81_v7 = vld [vmem:[#allocation2 + $0x98] sm:$0xff] }
  0x4d   :  { %373 = vmatpush1.bf16.msra.mxu0 %v1283_v11  ;;  %861 = vmatprep.subr.bf16.mxu1 %v1323_v47  ;;  %v1337_v8 = vld [vmem:[#allocation7 + $0x70] ss:$8 sps:$4 sm:$0xff]   ;;  %v132_v9 = vpack.c.bf16 %v76_v5, %v74_v4  ;;  %v1338_v10 = vld [vmem:[#allocation7 + $0x84] ss:$8 sps:$4 sm:$0xff]   ;;  %v135_v11 = vpack.c.bf16 %v81_v7, %v79_v6  ;;  %v1341_v13 = vld [vmem:[#allocation7 + $0x94] ss:$8 sps:$4 sm:$0xff]  }
  0x4e   :  { %374 = vmatprep.subr.bf16.mxu0 %v1284_v12  ;;  %v1340_v12 = vld [vmem:[#allocation7 + $0x80] ss:$8 sps:$4 sm:$0xff]   ;;  %v80_v15 = vld [vmem:[#allocation2 + $0x90] sm:$0xff]  ;;  %v101_v49 = vld [vmem:[#allocation2 + $0x138] sm:$0xff] }
  0x4f   :  { %v78_v14 = vld [vmem:[#allocation2 + $0x80] sm:$0xff]  ;;  %v88_v35 = vld [vmem:[#allocation2 + $0xd0] sm:$0xff]  ;;  %v91_v36 = vld [vmem:[#allocation2 + $0xe8] sm:$0xff] }
  0x50   :  { %862 = vmatpush1.bf16.msra.mxu1 %v1325_v52  ;;  %v86_v34 = vld [vmem:[#allocation2 + $0xc0] sm:$0xff]  ;;  %v92_v41 = vld [vmem:[#allocation2 + $0xf0] sm:$0xff]  ;;  %v95_v42 = vld [vmem:[#allocation2 + $0x108] sm:$0xff] }
  0x51   :  { %375 = vmatpush1.bf16.msra.mxu0 %v1286_v16  ;;  %863 = vmatprep.subr.bf16.mxu1 %v1326_v54  ;;  %v83_v16 = vld [vmem:[#allocation2 + $0xa8] sm:$0xff]  ;;  %v138_v38 = vpack.c.bf16 %v88_v35, %v86_v34  ;;  %v90_v40 = vld [vmem:[#allocation2 + $0xe0] sm:$0xff]  ;;  %v96_v47 = vld [vmem:[#allocation2 + $0x110] sm:$0xff] }
  0x52   :  { %376 = vmatprep.subr.bf16.mxu0 %v1287_v17  ;;  %v85_v17 = vld [vmem:[#allocation2 + $0xb8] sm:$0xff]  ;;  %v140_v44 = vpack.c.bf16 %v92_v41, %v90_v40  ;;  %v94_v46 = vld [vmem:[#allocation2 + $0x100] sm:$0xff]  ;;  %v99_v48 = vld [vmem:[#allocation2 + $0x128] sm:$0xff] }
  0x53   :  { %v142_v50 = vpack.c.bf16 %v96_v47, %v94_v46  ;;  %v145_v51 = vpack.c.bf16 %v101_v49, %v99_v48  ;;  %v98_v52 = vld [vmem:[#allocation2 + $0x120] sm:$0xff]  ;;  %v103_v54 = vld [vmem:[#allocation2 + $0x148] sm:$0xff]  ;;  %v104_v59 = vld [vmem:[#allocation2 + $0x150] sm:$0xff] }
  0x54   :  { %864 = vmatpush1.bf16.msra.mxu1 %v1328_v56  ;;  %v102_v58 = vld [vmem:[#allocation2 + $0x140] sm:$0xff]  ;;  %v107_v60 = vld [vmem:[#allocation2 + $0x168] sm:$0xff]  ;;  %v109_v61 = vld [vmem:[#allocation2 + $0x178] sm:$0xff] }
  0x55   :  { %377 = vmatpush1.bf16.msra.mxu0 %v1289_v18  ;;  %865 = vmatprep.subr.bf16.mxu1 %v1329_v57  ;;  %v1343_v18 = vld [vmem:[#allocation7 + $0x90] ss:$8 sps:$4 sm:$0xff]   ;;  %v1356_v6 = vld [vmem:[#allocation7 + $0xe4] ss:$8 sps:$4 sm:$0xff]   ;;  %v190_v35 = vld [vmem:[%s1710_s2] sm:$0x3] }
  0x56   :  { %378 = vmatprep.subr.bf16.mxu0 %v1290_v19  ;;  %v134_v19 = vpack.c.bf16 %v80_v15, %v78_v14  ;;  %v113_v4 = vld [vmem:[#allocation2 + $0x198] sm:$0xff] }
  0x57   :  { %v117_v14 = vld [vmem:[#allocation2 + $0x1b8] sm:$0xff] }
  0x58   :  { %866 = vmatpush1.bf16.msra.mxu1 %v1331_v62  ;;  %v146_v62 = vpack.c.bf16 %v104_v59, %v102_v58 }
  0x59   :  { %379 = vmatpush1.bf16.msra.mxu0 %v1292_v20  ;;  %867 = vmatprep.subr.bf16.mxu1 %v1332_v0  ;;  %v1344_v20 = vld [vmem:[#allocation7 + $0xa4] ss:$8 sps:$4 sm:$0xff]  }
  0x5a   :  { %380 = vmatprep.subr.bf16.mxu0 %v1293_v21  ;;  %v137_v21 = vpack.c.bf16 %v85_v17, %v83_v16  ;;  %v106_v0 = vld [vmem:[#allocation2 + $0x160] sm:$0xff] }
  0x5b   :  { %v114_v17 = vld [vmem:[#allocation2 + $0x1a0] sm:$0xff] }
  0x5c   :  { %868 = vmatpush1.bf16.msra.mxu1 %v1334_v2  ;;  %v1355_v2 = vld [vmem:[#allocation7 + $0xd0] ss:$8 sps:$4 sm:$0xff]  }
  0x5d   :  { %381 = vmatpush1.bf16.msra.mxu0 %v1295_v22  ;;  %869 = vmatprep.subr.bf16.mxu1 %v1335_v3  ;;  %v1346_v22 = vld [vmem:[#allocation7 + $0xa0] ss:$8 sps:$4 sm:$0xff]  }
  0x5e   :  { %382 = vmatprep.subr.bf16.mxu0 %v1296_v23  ;;  %v1347_v23 = vld [vmem:[#allocation7 + $0xb4] ss:$8 sps:$4 sm:$0xff]   ;;  %v111_v3 = vld [vmem:[#allocation2 + $0x188] sm:$0xff] }
  0x5f   :  { %v151_v7 = vpack.c.bf16 %v113_v4, %v111_v3 }
  0x60   :  { %870 = vmatpush1.bf16.msra.mxu1 %v1337_v8  ;;  %v1358_v8 = vld [vmem:[#allocation7 + $0xe0] ss:$8 sps:$4 sm:$0xff]  }
  0x61   :  { %383 = vmatpush1.bf16.msra.mxu0 %v1298_v24  ;;  %871 = vmatprep.subr.bf16.mxu1 %v1338_v10  ;;  %v82_v24 = vld [vmem:[#allocation2 + $0xa0] sm:$0xff] }
  0x62   :  { %384 = vmatprep.subr.bf16.mxu0 %v1299_v25  ;;  %v84_v25 = vld [vmem:[#allocation2 + $0xb0] sm:$0xff]  ;;  %v110_v10 = vld [vmem:[#allocation2 + $0x180] sm:$0xff] }
  0x64   :  { %872 = vmatpush1.bf16.msra.mxu1 %v1340_v12  ;;  %v1361_v12 = vld [vmem:[#allocation7 + $0xf0] ss:$8 sps:$4 sm:$0xff]  }
  0x65   :  { %385 = vmatpush1.bf16.msra.mxu0 %v1301_v26  ;;  %873 = vmatprep.subr.bf16.mxu1 %v1341_v13  ;;  %v87_v26 = vld [vmem:[#allocation2 + $0xc8] sm:$0xff] }
  0x66   :  { %386 = vmatprep.subr.bf16.mxu0 %v1302_v27  ;;  %v89_v27 = vld [vmem:[#allocation2 + $0xd8] sm:$0xff]  ;;  %v115_v13 = vld [vmem:[#allocation2 + $0x1a8] sm:$0xff] }
  0x67   :  { %v153_v16 = vpack.c.bf16 %v117_v14, %v115_v13 }
  0x68   :  { %874 = vmatpush1.bf16.msra.mxu1 %v1343_v18  ;;  %v116_v18 = vld [vmem:[#allocation2 + $0x1b0] sm:$0xff] }
  0x69   :  { %387 = vmatpush1.bf16.msra.mxu0 %v1304_v28  ;;  %875 = vmatprep.subr.bf16.mxu1 %v1344_v20  ;;  %v1349_v28 = vld [vmem:[#allocation7 + $0xb0] ss:$8 sps:$4 sm:$0xff]  }
  0x6a   :  { %388 = vmatprep.subr.bf16.mxu0 %v1305_v29  ;;  %v136_v29 = vpack.c.bf16 %v84_v25, %v82_v24  ;;  %v121_v20 = vld [vmem:[#allocation2 + $0x1d8] sm:$0xff]  ;;  %v120_v24 = vld [vmem:[#allocation2 + $0x1d0] sm:$0xff]  ;;  %v123_v25 = vld [vmem:[#allocation2 + $0x1e8] sm:$0xff] }
  0x6c   :  { %876 = vmatpush1.bf16.msra.mxu1 %v1346_v22 }
  0x6d   :  { %389 = vmatpush1.bf16.msra.mxu0 %v1307_v30  ;;  %877 = vmatprep.subr.bf16.mxu1 %v1347_v23  ;;  %v1350_v30 = vld [vmem:[#allocation7 + $0xc4] ss:$8 sps:$4 sm:$0xff]  }
  0x6e   :  { %390 = vmatprep.subr.bf16.mxu0 %v1308_v31  ;;  %v139_v31 = vpack.c.bf16 %v89_v27, %v87_v26  ;;  %v118_v23 = vld [vmem:[#allocation2 + $0x1c0] sm:$0xff]  ;;  %v125_v26 = vld [vmem:[#allocation2 + $0x1f8] sm:$0xff] }
  0x6f   :  { %v154_v27 = vpack.c.bf16 %v120_v24, %v118_v23 }
  0x70   :  { %878 = vmatpush1.bf16.msra.mxu1 %v1349_v28  ;;  %v157_v28 = vpack.c.bf16 %v125_v26, %v123_v25 }
  0x71   :  { %391 = vmatpush1.bf16.msra.mxu0 %v1310_v32  ;;  %v1352_v32 = vld [vmem:[#allocation7 + $0xc0] ss:$8 sps:$4 sm:$0xff]   ;;  %879 = vmatprep.subr.bf16.mxu1 %v1350_v30  ;;  %v124_v30 = vld [vmem:[#allocation2 + $0x1f0] sm:$0xff] }
  0x72   :  { %392 = vmatprep.subr.bf16.mxu0 %v1311_v33  ;;  %v1353_v33 = vld [vmem:[#allocation7 + $0xd4] ss:$8 sps:$4 sm:$0xff]  }
  0x74   :  { %880 = vmatpush1.bf16.msra.mxu1 %v1352_v32  ;;  %v192_v32 = vlaneseq }
  0x75   :  { %393 = vmatpush1.bf16.msra.mxu0 %v1313_v37  ;;  %v93_v37 = vld [vmem:[#allocation2 + $0xf8] sm:$0xff]  ;;  %881 = vmatprep.subr.bf16.mxu1 %v1353_v33 }
  0x76   :  { %v141_v39 = vpack.c.bf16 %v93_v37, %v91_v36  ;;  %v1539_v33 = vshrl.u32 %v192_v32, 7 }
  0x78   :  { %395 = vmatmul.mubr.bf16.vlgmr.msra.gmra.mrb[0].mxu0 %v126_v43  ;;  %v97_v43 = vld [vmem:[#allocation2 + $0x118] sm:$0xff]  ;;  %882 = vmatpush1.bf16.msra.mxu1 %v1355_v2  ;;  %v194_v34 = vsub.s32 0, %v1539_v33  ;;  %v198_v36 = vsub.s32 1, %v1539_v33 }
  0x79   :  { %404 = vmatprep.mubr.bf16.mxu0 %v129_v45  ;;  %v143_v45 = vpack.c.bf16 %v97_v43, %v95_v42  ;;  %883 = vmatprep.subr.bf16.mxu1 %v1356_v6 }
  0x7a   :  { %v1548_v37 = vrot.slane %v190_v35, %v194_v34 }
  0x7c   :  { %884 = vmatpush1.bf16.msra.mxu1 %v1358_v8 }
  0x80   :  { %405 = vmatmul.mubr.bf16.gmra.mrb[4].mxu0 %v128_v53  ;;  %v100_v53 = vld [vmem:[#allocation2 + $0x130] sm:$0xff] }
  0x81   :  { %414 = vmatprep.mubr.bf16.mxu0 %v131_v55  ;;  %v105_v55 = vld [vmem:[#allocation2 + $0x158] sm:$0xff]  ;;  %v144_v56 = vpack.c.bf16 %v100_v53, %v98_v52 }
  0x82   :  { %v147_v57 = vpack.c.bf16 %v105_v55, %v103_v54 }
  0x88   :  { %415 = vmatmul.mubr.bf16.gmra.mrb[8].mxu0 %v130_v63  ;;  %v149_v63 = vpack.c.bf16 %v109_v61, %v107_v60 }
  0x89   :  { %424 = vmatprep.mubr.bf16.mxu0 %v133_v1  ;;  %v108_v1 = vld [vmem:[#allocation2 + $0x170] sm:$0xff] }
  0x8a   :  { %v148_v5 = vpack.c.bf16 %v108_v1, %v106_v0 }
  0x90   :  { %425 = vmatmul.mubr.bf16.gmra.mrb[12].mxu0 %v132_v9  ;;  %v1359_v9 = vld [vmem:[#allocation7 + $0xf4] ss:$8 sps:$4 sm:$0xff]  }
  0x91   :  { %434 = vmatprep.mubr.bf16.mxu0 %v135_v11  ;;  %v112_v11 = vld [vmem:[#allocation2 + $0x190] sm:$0xff]  ;;  %885 = vmatprep.subr.bf16.mxu1 %v1359_v9 }
  0x92   :  { %886 = vmatpush1.bf16.msra.mxu1 %v1361_v12  ;;  %v150_v15 = vpack.c.bf16 %v112_v11, %v110_v10 }
  0x98   :  { %435 = vmatmul.mubr.bf16.gmra.mrb[16].mxu0 %v134_v19  ;;  %v119_v19 = vld [vmem:[#allocation2 + $0x1c8] sm:$0xff] }
  0x99   :  { %444 = vmatprep.mubr.bf16.mxu0 %v137_v21  ;;  %v152_v21 = vpack.c.bf16 %v116_v18, %v114_v17  ;;  %v155_v22 = vpack.c.bf16 %v121_v20, %v119_v19 }
  0xa0   :  { %445 = vmatmul.mubr.bf16.gmra.mrb[20].mxu0 %v136_v29  ;;  %v122_v29 = vld [vmem:[#allocation2 + $0x1e0] sm:$0xff] }
  0xa1   :  { %454 = vmatprep.mubr.bf16.mxu0 %v139_v31  ;;  %v156_v31 = vpack.c.bf16 %v124_v30, %v122_v29 }
  0xa8   :  { %455 = vmatmul.mubr.bf16.gmra.mrb[24].mxu0 %v138_v38  ;;  %v1552_v38 = vrot.slane %v190_v35, %v198_v36 }
  0xa9   :  { %464 = vmatprep.mubr.bf16.mxu0 %v141_v39 }
  0xb0   :  { %465 = vmatmul.mubr.bf16.gmra.mrb[28].mxu0 %v140_v44 }
  0xb1   :  { %474 = vmatprep.mubr.bf16.mxu0 %v143_v45 }
  0xb8   :  { %475 = vmatmul.mubr.bf16.gmra.mrb[32].mxu0 %v142_v50 }
  0xb9   :  { %484 = vmatprep.mubr.bf16.mxu0 %v145_v51 }
  0xc0   :  { %485 = vmatmul.mubr.bf16.gmra.mrb[36].mxu0 %v144_v56 }
  0xc1   :  { %494 = vmatprep.mubr.bf16.mxu0 %v147_v57 }
  0xc8   :  { %495 = vmatmul.mubr.bf16.gmra.mrb[40].mxu0 %v146_v62 }
  0xc9   :  { %504 = vmatprep.mubr.bf16.mxu0 %v149_v63 }
  0xd0   :  { %505 = vmatmul.mubr.bf16.gmra.mrb[44].mxu0 %v148_v5 }
  0xd1   :  { %514 = vmatprep.mubr.bf16.mxu0 %v151_v7 }
  0xd8   :  { %515 = vmatmul.mubr.bf16.gmra.mrb[48].mxu0 %v150_v15 }
  0xd9   :  { %524 = vmatprep.mubr.bf16.mxu0 %v153_v16 }
  0xe0   :  { %525 = vmatmul.mubr.bf16.gmra.mrb[52].mxu0 %v152_v21 }
  0xe1   :  { %534 = vmatprep.mubr.bf16.mxu0 %v155_v22 }
  0xe8   :  { %535 = vmatmul.mubr.bf16.gmra.mrb[56].mxu0 %v154_v27 }
  0xe9   :  { %544 = vmatprep.mubr.bf16.mxu0 %v157_v28 }
  0xf0   :  { %545 = vmatmul.mubr.bf16.gmra.mrb[60].mxu0 %v156_v31 }
 0x14b   :  { %v396_v39 = vpop.f32.mrb[0].mxu0 }
 0x14c   :  { %v397_v40 = vadd.f32 %v396_v39, %v1548_v37  ;;  %v398_v41 = vpop.f32.mrb[1].mxu0 }
 0x14d   :  { %v399_v42 = vadd.f32 %v398_v41, %v1552_v38  ;;  %v400_v43 = vpop.f32.mrb[2].mxu0 }
 0x14e   :  { %v401_v44 = vadd.f32 %v400_v43, %v1548_v37  ;;  %v402_v45 = vpop.f32.mrb[3].mxu0  ;;  %v555_v47 = vmax.f32 %v397_v40, 0.0 }
 0x14f   :  { %v403_v46 = vadd.f32 %v402_v45, %v1552_v38  ;;  %v556_v49 = vmax.f32 %v399_v42, 0.0 }
 0x150   :  { %v557_v48 = vmax.f32 %v401_v44, 0.0 }
 0x151   :  { %v558_v50 = vmax.f32 %v403_v46, 0.0 }
 0x152   :  { %v619_v51 = vpack.c.bf16 %v557_v48, %v555_v47 }
 0x153   :  { %v406_v52 = vpop.f32.mrb[4].mxu0  ;;  %v620_v53 = vpack.c.bf16 %v558_v50, %v556_v49 }
 0x154   :  { %v407_v54 = vadd.f32 %v406_v52, %v1548_v37  ;;  %v408_v55 = vpop.f32.mrb[5].mxu0 }
 0x155   :  { %v409_v56 = vadd.f32 %v408_v55, %v1552_v38  ;;  %v410_v57 = vpop.f32.mrb[6].mxu0  ;;  %887 = vmatprep.mubr.bf16.mxu1 %v620_v53 }
 0x156   :  { %v411_v58 = vadd.f32 %v410_v57, %v1548_v37  ;;  %v412_v59 = vpop.f32.mrb[7].mxu0  ;;  %888 = vmatmul.mubr.bf16.vlgmr.msra.gmra.mrb[0].mxu1 %v619_v51  ;;  %v559_v61 = vmax.f32 %v407_v54, 0.0 }
 0x157   :  { %v413_v60 = vadd.f32 %v412_v59, %v1552_v38  ;;  %v560_v63 = vmax.f32 %v409_v56, 0.0 }
 0x158   :  { %v561_v62 = vmax.f32 %v411_v58, 0.0 }
 0x159   :  { %v562_v0 = vmax.f32 %v413_v60, 0.0 }
 0x15a   :  { %v621_v1 = vpack.c.bf16 %v561_v62, %v559_v61 }
 0x15b   :  { %v622_v2 = vpack.c.bf16 %v562_v0, %v560_v63  ;;  %v416_v3 = vpop.f32.mrb[8].mxu0 }
 0x15c   :  { %v417_v4 = vadd.f32 %v416_v3, %v1548_v37  ;;  %v418_v5 = vpop.f32.mrb[9].mxu0 }
 0x15d   :  { %v419_v6 = vadd.f32 %v418_v5, %v1552_v38  ;;  %v420_v7 = vpop.f32.mrb[10].mxu0  ;;  %897 = vmatprep.mubr.bf16.mxu1 %v622_v2 }
 0x15e   :  { %v421_v8 = vadd.f32 %v420_v7, %v1548_v37  ;;  %v422_v9 = vpop.f32.mrb[11].mxu0  ;;  %898 = vmatmul.mubr.bf16.gmra.mrb[4].mxu1 %v621_v1  ;;  %v563_v11 = vmax.f32 %v417_v4, 0.0 }
 0x15f   :  { %v423_v10 = vadd.f32 %v422_v9, %v1552_v38  ;;  %v564_v13 = vmax.f32 %v419_v6, 0.0 }
 0x160   :  { %v565_v12 = vmax.f32 %v421_v8, 0.0 }
 0x161   :  { %v566_v14 = vmax.f32 %v423_v10, 0.0 }
 0x162   :  { %v623_v15 = vpack.c.bf16 %v565_v12, %v563_v11 }
 0x163   :  { %v624_v16 = vpack.c.bf16 %v566_v14, %v564_v13  ;;  %v426_v17 = vpop.f32.mrb[12].mxu0 }
 0x164   :  { %v427_v18 = vadd.f32 %v426_v17, %v1548_v37  ;;  %v428_v19 = vpop.f32.mrb[13].mxu0 }
 0x165   :  { %v429_v20 = vadd.f32 %v428_v19, %v1552_v38  ;;  %v430_v21 = vpop.f32.mrb[14].mxu0  ;;  %907 = vmatprep.mubr.bf16.mxu1 %v624_v16 }
 0x166   :  { %v431_v22 = vadd.f32 %v430_v21, %v1548_v37  ;;  %v432_v23 = vpop.f32.mrb[15].mxu0  ;;  %908 = vmatmul.mubr.bf16.gmra.mrb[8].mxu1 %v623_v15  ;;  %v567_v25 = vmax.f32 %v427_v18, 0.0 }
 0x167   :  { %v433_v24 = vadd.f32 %v432_v23, %v1552_v38  ;;  %v568_v27 = vmax.f32 %v429_v20, 0.0 }
 0x168   :  { %v569_v26 = vmax.f32 %v431_v22, 0.0 }
 0x169   :  { %v570_v28 = vmax.f32 %v433_v24, 0.0 }
 0x16a   :  { %v625_v29 = vpack.c.bf16 %v569_v26, %v567_v25 }
 0x16b   :  { %v626_v30 = vpack.c.bf16 %v570_v28, %v568_v27  ;;  %v436_v31 = vpop.f32.mrb[16].mxu0 }
 0x16c   :  { %v437_v32 = vadd.f32 %v436_v31, %v1548_v37  ;;  %v438_v35 = vpop.f32.mrb[17].mxu0 }
 0x16d   :  { %v439_v39 = vadd.f32 %v438_v35, %v1552_v38  ;;  %v440_v40 = vpop.f32.mrb[18].mxu0  ;;  %917 = vmatprep.mubr.bf16.mxu1 %v626_v30 }
 0x16e   :  { %v441_v41 = vadd.f32 %v440_v40, %v1548_v37  ;;  %v442_v42 = vpop.f32.mrb[19].mxu0  ;;  %918 = vmatmul.mubr.bf16.gmra.mrb[12].mxu1 %v625_v29  ;;  %v571_v44 = vmax.f32 %v437_v32, 0.0 }
 0x16f   :  { %v443_v43 = vadd.f32 %v442_v42, %v1552_v38  ;;  %v572_v46 = vmax.f32 %v439_v39, 0.0 }
 0x170   :  { %v573_v45 = vmax.f32 %v441_v41, 0.0 }
 0x171   :  { %v574_v47 = vmax.f32 %v443_v43, 0.0 }
 0x172   :  { %v627_v48 = vpack.c.bf16 %v573_v45, %v571_v44 }
 0x173   :  { %v628_v49 = vpack.c.bf16 %v574_v47, %v572_v46  ;;  %v446_v50 = vpop.f32.mrb[20].mxu0 }
 0x174   :  { %v447_v51 = vadd.f32 %v446_v50, %v1548_v37  ;;  %v448_v52 = vpop.f32.mrb[21].mxu0 }
 0x175   :  { %v449_v53 = vadd.f32 %v448_v52, %v1552_v38  ;;  %v450_v54 = vpop.f32.mrb[22].mxu0  ;;  %927 = vmatprep.mubr.bf16.mxu1 %v628_v49 }
 0x176   :  { %v451_v55 = vadd.f32 %v450_v54, %v1548_v37  ;;  %v452_v56 = vpop.f32.mrb[23].mxu0  ;;  %928 = vmatmul.mubr.bf16.gmra.mrb[16].mxu1 %v627_v48  ;;  %v575_v58 = vmax.f32 %v447_v51, 0.0 }
 0x177   :  { %v453_v57 = vadd.f32 %v452_v56, %v1552_v38  ;;  %v576_v60 = vmax.f32 %v449_v53, 0.0 }
 0x178   :  { %v577_v59 = vmax.f32 %v451_v55, 0.0 }
 0x179   :  { %v578_v61 = vmax.f32 %v453_v57, 0.0 }
 0x17a   :  { %v629_v62 = vpack.c.bf16 %v577_v59, %v575_v58 }
 0x17b   :  { %v630_v63 = vpack.c.bf16 %v578_v61, %v576_v60  ;;  %v456_v0 = vpop.f32.mrb[24].mxu0 }
 0x17c   :  { %v457_v1 = vadd.f32 %v456_v0, %v1548_v37  ;;  %v458_v2 = vpop.f32.mrb[25].mxu0 }
 0x17d   :  { %v459_v3 = vadd.f32 %v458_v2, %v1552_v38  ;;  %v460_v4 = vpop.f32.mrb[26].mxu0  ;;  %937 = vmatprep.mubr.bf16.mxu1 %v630_v63 }
 0x17e   :  { %v461_v5 = vadd.f32 %v460_v4, %v1548_v37  ;;  %v462_v6 = vpop.f32.mrb[27].mxu0  ;;  %938 = vmatmul.mubr.bf16.gmra.mrb[20].mxu1 %v629_v62  ;;  %v579_v8 = vmax.f32 %v457_v1, 0.0 }
 0x17f   :  { %v463_v7 = vadd.f32 %v462_v6, %v1552_v38  ;;  %v580_v10 = vmax.f32 %v459_v3, 0.0 }
 0x180   :  { %v581_v9 = vmax.f32 %v461_v5, 0.0 }
 0x181   :  { %v582_v11 = vmax.f32 %v463_v7, 0.0 }
 0x182   :  { %v631_v12 = vpack.c.bf16 %v581_v9, %v579_v8 }
 0x183   :  { %v632_v13 = vpack.c.bf16 %v582_v11, %v580_v10  ;;  %v466_v14 = vpop.f32.mrb[28].mxu0 }
 0x184   :  { %v467_v15 = vadd.f32 %v466_v14, %v1548_v37  ;;  %v468_v16 = vpop.f32.mrb[29].mxu0 }
 0x185   :  { %v469_v17 = vadd.f32 %v468_v16, %v1552_v38  ;;  %v470_v18 = vpop.f32.mrb[30].mxu0  ;;  %947 = vmatprep.mubr.bf16.mxu1 %v632_v13 }
 0x186   :  { %v471_v19 = vadd.f32 %v470_v18, %v1548_v37  ;;  %v472_v20 = vpop.f32.mrb[31].mxu0  ;;  %948 = vmatmul.mubr.bf16.gmra.mrb[24].mxu1 %v631_v12  ;;  %v583_v22 = vmax.f32 %v467_v15, 0.0 }
 0x187   :  { %v473_v21 = vadd.f32 %v472_v20, %v1552_v38  ;;  %v584_v24 = vmax.f32 %v469_v17, 0.0 }
 0x188   :  { %v585_v23 = vmax.f32 %v471_v19, 0.0 }
 0x189   :  { %v586_v25 = vmax.f32 %v473_v21, 0.0 }
 0x18a   :  { %v633_v26 = vpack.c.bf16 %v585_v23, %v583_v22 }
 0x18b   :  { %v634_v27 = vpack.c.bf16 %v586_v25, %v584_v24  ;;  %v476_v28 = vpop.f32.mrb[32].mxu0 }
 0x18c   :  { %v477_v29 = vadd.f32 %v476_v28, %v1548_v37  ;;  %v478_v30 = vpop.f32.mrb[33].mxu0 }
 0x18d   :  { %v479_v31 = vadd.f32 %v478_v30, %v1552_v38  ;;  %v480_v32 = vpop.f32.mrb[34].mxu0  ;;  %957 = vmatprep.mubr.bf16.mxu1 %v634_v27 }
 0x18e   :  { %v481_v35 = vadd.f32 %v480_v32, %v1548_v37  ;;  %v482_v39 = vpop.f32.mrb[35].mxu0  ;;  %958 = vmatmul.mubr.bf16.gmra.mrb[28].mxu1 %v633_v26  ;;  %v587_v41 = vmax.f32 %v477_v29, 0.0 }
 0x18f   :  { %v483_v40 = vadd.f32 %v482_v39, %v1552_v38  ;;  %v588_v43 = vmax.f32 %v479_v31, 0.0 }
 0x190   :  { %v589_v42 = vmax.f32 %v481_v35, 0.0 }
 0x191   :  { %v590_v44 = vmax.f32 %v483_v40, 0.0 }
 0x192   :  { %v635_v45 = vpack.c.bf16 %v589_v42, %v587_v41 }
 0x193   :  { %v636_v46 = vpack.c.bf16 %v590_v44, %v588_v43  ;;  %v486_v47 = vpop.f32.mrb[36].mxu0 }
 0x194   :  { %v487_v48 = vadd.f32 %v486_v47, %v1548_v37  ;;  %v488_v49 = vpop.f32.mrb[37].mxu0 }
 0x195   :  { %v489_v50 = vadd.f32 %v488_v49, %v1552_v38  ;;  %v490_v51 = vpop.f32.mrb[38].mxu0  ;;  %967 = vmatprep.mubr.bf16.mxu1 %v636_v46 }
 0x196   :  { %v491_v52 = vadd.f32 %v490_v51, %v1548_v37  ;;  %v492_v53 = vpop.f32.mrb[39].mxu0  ;;  %968 = vmatmul.mubr.bf16.gmra.mrb[32].mxu1 %v635_v45  ;;  %v591_v55 = vmax.f32 %v487_v48, 0.0 }
 0x197   :  { %v493_v54 = vadd.f32 %v492_v53, %v1552_v38  ;;  %v592_v57 = vmax.f32 %v489_v50, 0.0 }
 0x198   :  { %v593_v56 = vmax.f32 %v491_v52, 0.0 }
 0x199   :  { %v594_v58 = vmax.f32 %v493_v54, 0.0 }
 0x19a   :  { %v637_v59 = vpack.c.bf16 %v593_v56, %v591_v55 }
 0x19b   :  { %v638_v60 = vpack.c.bf16 %v594_v58, %v592_v57  ;;  %v496_v61 = vpop.f32.mrb[40].mxu0 }
 0x19c   :  { %v497_v62 = vadd.f32 %v496_v61, %v1548_v37  ;;  %v498_v63 = vpop.f32.mrb[41].mxu0 }
 0x19d   :  { %v499_v0 = vadd.f32 %v498_v63, %v1552_v38  ;;  %v500_v1 = vpop.f32.mrb[42].mxu0  ;;  %977 = vmatprep.mubr.bf16.mxu1 %v638_v60 }
 0x19e   :  { %v501_v2 = vadd.f32 %v500_v1, %v1548_v37  ;;  %v502_v3 = vpop.f32.mrb[43].mxu0  ;;  %978 = vmatmul.mubr.bf16.gmra.mrb[36].mxu1 %v637_v59  ;;  %v595_v5 = vmax.f32 %v497_v62, 0.0 }
 0x19f   :  { %v503_v4 = vadd.f32 %v502_v3, %v1552_v38  ;;  %v596_v7 = vmax.f32 %v499_v0, 0.0 }
 0x1a0   :  { %v597_v6 = vmax.f32 %v501_v2, 0.0 }
 0x1a1   :  { %v598_v8 = vmax.f32 %v503_v4, 0.0 }
 0x1a2   :  { %v639_v9 = vpack.c.bf16 %v597_v6, %v595_v5 }
 0x1a3   :  { %v640_v10 = vpack.c.bf16 %v598_v8, %v596_v7  ;;  %v506_v11 = vpop.f32.mrb[44].mxu0 }
 0x1a4   :  { %v507_v12 = vadd.f32 %v506_v11, %v1548_v37  ;;  %v508_v13 = vpop.f32.mrb[45].mxu0 }
 0x1a5   :  { %v509_v14 = vadd.f32 %v508_v13, %v1552_v38  ;;  %v510_v15 = vpop.f32.mrb[46].mxu0  ;;  %987 = vmatprep.mubr.bf16.mxu1 %v640_v10 }
 0x1a6   :  { %v511_v16 = vadd.f32 %v510_v15, %v1548_v37  ;;  %v512_v17 = vpop.f32.mrb[47].mxu0  ;;  %988 = vmatmul.mubr.bf16.gmra.mrb[40].mxu1 %v639_v9  ;;  %v599_v19 = vmax.f32 %v507_v12, 0.0 }
 0x1a7   :  { %v513_v18 = vadd.f32 %v512_v17, %v1552_v38  ;;  %v600_v21 = vmax.f32 %v509_v14, 0.0 }
 0x1a8   :  { %v601_v20 = vmax.f32 %v511_v16, 0.0 }
 0x1a9   :  { %v602_v22 = vmax.f32 %v513_v18, 0.0 }
 0x1aa   :  { %v641_v23 = vpack.c.bf16 %v601_v20, %v599_v19 }
 0x1ab   :  { %v642_v24 = vpack.c.bf16 %v602_v22, %v600_v21  ;;  %v516_v25 = vpop.f32.mrb[48].mxu0  ;;  %v683_v22 = vld [vmem:[%s1712_s4] sm:$0x3]  ;;  %s1463_s4 = smov [#allocation8]  }
 0x1ac   :  { %v517_v26 = vadd.f32 %v516_v25, %v1548_v37  ;;  %v518_v27 = vpop.f32.mrb[49].mxu0  ;;  %s1181_s8 = sshll.u32 %s1463_s4, 4  ;;  %s1182_s8 = int_to_ptr.vmem [resolvable:$true] %s1181_s8 }
 0x1ad   :  { %v519_v28 = vadd.f32 %v518_v27, %v1552_v38  ;;  %v520_v29 = vpop.f32.mrb[50].mxu0  ;;  %997 = vmatprep.mubr.bf16.mxu1 %v642_v24  ;;  %s1428_s9 = scalar_lea.vmem %s1182_s8, 8192  ;;  %p1433_p11 = scmp.lt.s32.totalorder %s1182_s8, %s1182_s8 }
 0x1ae   :  { %v521_v30 = vadd.f32 %v520_v29, %v1548_v37  ;;  %v522_v31 = vpop.f32.mrb[51].mxu0  ;;  %998 = vmatmul.mubr.bf16.gmra.mrb[44].mxu1 %v641_v23  ;;  %v603_v35 = vmax.f32 %v517_v26, 0.0  ;;  %v1623_v23 = vrot.slane %v683_v22, %v194_v34  ;;  %p1429_p10 = scmp.ne.s32.totalorder %s1182_s8, %s1428_s9  ;;  %p1434_p12 = scmp.lt.s32.totalorder %s1428_s9, %s1428_s9 }
 0x1af   :  { %v523_v32 = vadd.f32 %v522_v31, %v1552_v38  ;;  %v604_v40 = vmax.f32 %v519_v28, 0.0 }
 0x1b0   :  { %v605_v39 = vmax.f32 %v521_v30, 0.0  ;;  %p1435_p13 = por %p1434_p12, %p1433_p11 }
 0x1b1   :  { %v606_v41 = vmax.f32 %v523_v32, 0.0 }
 0x1b2   :  { %v643_v42 = vpack.c.bf16 %v605_v39, %v603_v35  ;;  %p1436_p0 = pnand %p1435_p13, %p1429_p10 }
 0x1b3   :  { %v644_v43 = vpack.c.bf16 %v606_v41, %v604_v40  ;;  %v526_v44 = vpop.f32.mrb[52].mxu0 }
 0x1b4   :  { %v527_v45 = vadd.f32 %v526_v44, %v1548_v37  ;;  %v528_v46 = vpop.f32.mrb[53].mxu0 }
 0x1b5   :  { %v529_v47 = vadd.f32 %v528_v46, %v1552_v38  ;;  %v530_v48 = vpop.f32.mrb[54].mxu0  ;;  %1007 = vmatprep.mubr.bf16.mxu1 %v644_v43 }
 0x1b6   :  { %v531_v49 = vadd.f32 %v530_v48, %v1548_v37  ;;  %v532_v50 = vpop.f32.mrb[55].mxu0  ;;  %1008 = vmatmul.mubr.bf16.gmra.mrb[48].mxu1 %v643_v42  ;;  %v607_v52 = vmax.f32 %v527_v45, 0.0 }
 0x1b7   :  { %v533_v51 = vadd.f32 %v532_v50, %v1552_v38  ;;  %v608_v54 = vmax.f32 %v529_v47, 0.0 }
 0x1b8   :  { %v609_v53 = vmax.f32 %v531_v49, 0.0 }
 0x1b9   :  { %v610_v55 = vmax.f32 %v533_v51, 0.0 }
 0x1ba   :  { %v645_v56 = vpack.c.bf16 %v609_v53, %v607_v52 }
 0x1bb   :  { %v646_v57 = vpack.c.bf16 %v610_v55, %v608_v54  ;;  %v536_v58 = vpop.f32.mrb[56].mxu0 }
 0x1bc   :  { %v537_v59 = vadd.f32 %v536_v58, %v1548_v37  ;;  %v538_v60 = vpop.f32.mrb[57].mxu0 }
 0x1bd   :  { %v539_v61 = vadd.f32 %v538_v60, %v1552_v38  ;;  %v540_v62 = vpop.f32.mrb[58].mxu0  ;;  %1017 = vmatprep.mubr.bf16.mxu1 %v646_v57 }
 0x1be   :  { %v541_v63 = vadd.f32 %v540_v62, %v1548_v37  ;;  %v542_v0 = vpop.f32.mrb[59].mxu0  ;;  %1018 = vmatmul.mubr.bf16.gmra.mrb[52].mxu1 %v645_v56  ;;  %v611_v2 = vmax.f32 %v537_v59, 0.0 }
 0x1bf   :  { %v543_v1 = vadd.f32 %v542_v0, %v1552_v38  ;;  %v612_v4 = vmax.f32 %v539_v61, 0.0 }
 0x1c0   :  { %v613_v3 = vmax.f32 %v541_v63, 0.0 }
 0x1c1   :  { %v614_v5 = vmax.f32 %v543_v1, 0.0 }
 0x1c2   :  { %v647_v6 = vpack.c.bf16 %v613_v3, %v611_v2 }
 0x1c3   :  { %v648_v7 = vpack.c.bf16 %v614_v5, %v612_v4  ;;  %v546_v8 = vpop.f32.mrb[60].mxu0 }
 0x1c4   :  { %v547_v9 = vadd.f32 %v546_v8, %v1548_v37  ;;  %v548_v10 = vpop.f32.mrb[61].mxu0 }
 0x1c5   :  { %v549_v11 = vadd.f32 %v548_v10, %v1552_v38  ;;  %v550_v12 = vpop.f32.mrb[62].mxu0  ;;  %1027 = vmatprep.mubr.bf16.mxu1 %v648_v7 }
 0x1c6   :  { %v551_v13 = vadd.f32 %v550_v12, %v1548_v37  ;;  %v552_v14 = vpop.f32.mrb[63].mxu0  ;;  %1028 = vmatmul.mubr.bf16.gmra.mrb[56].mxu1 %v647_v6  ;;  %v615_v16 = vmax.f32 %v547_v9, 0.0  ;;  %v1627_v37 = vrot.slane %v683_v22, %v198_v36 }
 0x1c7   :  { %v553_v15 = vadd.f32 %v552_v14, %v1552_v38  ;;  %v616_v18 = vmax.f32 %v549_v11, 0.0 }
 0x1c8   :  { %v617_v17 = vmax.f32 %v551_v13, 0.0 }
 0x1c9   :  { %v618_v19 = vmax.f32 %v553_v15, 0.0 }
 0x1ca   :  { %v649_v20 = vpack.c.bf16 %v617_v17, %v615_v16 }
 0x1cb   :  { %v650_v21 = vpack.c.bf16 %v618_v19, %v616_v18 }
 0x1cd   :  { %1037 = vmatprep.mubr.bf16.mxu1 %v650_v21 }
 0x1ce   :  { %1038 = vmatmul.mubr.bf16.gmra.mrb[60].mxu1 %v649_v20 }
 0x229   :  { %v889_v38 = vpop.f32.mrb[0].mxu1 }
 0x22a   :  { %v890_v24 = vadd.f32 %v889_v38, %v1623_v23  ;;  %v891_v25 = vpop.f32.mrb[1].mxu1 }
 0x22b   :  { %v892_v26 = vadd.f32 %v891_v25, %v1627_v37  ;;  %v893_v27 = vpop.f32.mrb[2].mxu1 }
 0x22c   :  { %v1048_v28 = vmul.f32 2.0, %v890_v24  ;;  %v894_v29 = vadd.f32 %v893_v27, %v1623_v23  ;;  %v895_v30 = vpop.f32.mrb[3].mxu1 }
 0x22d   :  { %v1049_v31 = vmul.f32 2.0, %v892_v26  ;;  %v896_v32 = vadd.f32 %v895_v30, %v1627_v37 }
 0x22e   :  { %1112 = vst [vmem:[#allocation8] sm:$0xff] %v1048_v28  ;;  %v1050_v34 = vmul.f32 2.0, %v894_v29 }
 0x22f   :  { %1113 = vst [vmem:[#allocation8 + $0x8] sm:$0xff] %v1049_v31  ;;  %v1051_v33 = vmul.f32 2.0, %v896_v32 }
 0x230   :  { %1114 = vst [vmem:[#allocation8 + $0x10] sm:$0xff] %v1050_v34 }
 0x231   :  { %1115 = vst [vmem:[#allocation8 + $0x18] sm:$0xff] %v1051_v33  ;;  %v899_v36 = vpop.f32.mrb[4].mxu1 }
 0x232   :  { %v900_v35 = vadd.f32 %v899_v36, %v1623_v23  ;;  %v901_v39 = vpop.f32.mrb[5].mxu1 }
 0x233   :  { %v902_v40 = vadd.f32 %v901_v39, %v1627_v37  ;;  %v903_v41 = vpop.f32.mrb[6].mxu1 }
 0x234   :  { %v1052_v42 = vmul.f32 2.0, %v900_v35  ;;  %v904_v43 = vadd.f32 %v903_v41, %v1623_v23  ;;  %v905_v44 = vpop.f32.mrb[7].mxu1 }
 0x235   :  { %v1053_v45 = vmul.f32 2.0, %v902_v40  ;;  %v906_v46 = vadd.f32 %v905_v44, %v1627_v37 }
 0x236   :  { %1116 = vst [vmem:[#allocation8 + $0x20] sm:$0xff] %v1052_v42  ;;  %v1054_v47 = vmul.f32 2.0, %v904_v43 }
 0x237   :  { %1117 = vst [vmem:[#allocation8 + $0x28] sm:$0xff] %v1053_v45  ;;  %v1055_v48 = vmul.f32 2.0, %v906_v46 }
 0x238   :  { %1118 = vst [vmem:[#allocation8 + $0x30] sm:$0xff] %v1054_v47 }
 0x239   :  { %1119 = vst [vmem:[#allocation8 + $0x38] sm:$0xff] %v1055_v48  ;;  %v909_v49 = vpop.f32.mrb[8].mxu1 }
 0x23a   :  { %v910_v50 = vadd.f32 %v909_v49, %v1623_v23  ;;  %v911_v51 = vpop.f32.mrb[9].mxu1 }
 0x23b   :  { %v912_v52 = vadd.f32 %v911_v51, %v1627_v37  ;;  %v913_v53 = vpop.f32.mrb[10].mxu1 }
 0x23c   :  { %v1056_v54 = vmul.f32 2.0, %v910_v50  ;;  %v914_v55 = vadd.f32 %v913_v53, %v1623_v23  ;;  %v915_v56 = vpop.f32.mrb[11].mxu1 }
 0x23d   :  { %v1057_v57 = vmul.f32 2.0, %v912_v52  ;;  %v916_v58 = vadd.f32 %v915_v56, %v1627_v37 }
 0x23e   :  { %1120 = vst [vmem:[#allocation8 + $0x40] sm:$0xff] %v1056_v54  ;;  %v1058_v59 = vmul.f32 2.0, %v914_v55 }
 0x23f   :  { %1121 = vst [vmem:[#allocation8 + $0x48] sm:$0xff] %v1057_v57  ;;  %v1059_v60 = vmul.f32 2.0, %v916_v58 }
 0x240   :  { %1122 = vst [vmem:[#allocation8 + $0x50] sm:$0xff] %v1058_v59 }
 0x241   :  { %1123 = vst [vmem:[#allocation8 + $0x58] sm:$0xff] %v1059_v60  ;;  %v919_v61 = vpop.f32.mrb[12].mxu1 }
 0x242   :  { %v920_v62 = vadd.f32 %v919_v61, %v1623_v23  ;;  %v921_v63 = vpop.f32.mrb[13].mxu1 }
 0x243   :  { %v922_v0 = vadd.f32 %v921_v63, %v1627_v37  ;;  %v923_v1 = vpop.f32.mrb[14].mxu1 }
 0x244   :  { %v1060_v2 = vmul.f32 2.0, %v920_v62  ;;  %v924_v3 = vadd.f32 %v923_v1, %v1623_v23  ;;  %v925_v4 = vpop.f32.mrb[15].mxu1 }
 0x245   :  { %v1061_v5 = vmul.f32 2.0, %v922_v0  ;;  %v926_v6 = vadd.f32 %v925_v4, %v1627_v37 }
 0x246   :  { %1124 = vst [vmem:[#allocation8 + $0x60] sm:$0xff] %v1060_v2  ;;  %v1062_v7 = vmul.f32 2.0, %v924_v3 }
 0x247   :  { %1125 = vst [vmem:[#allocation8 + $0x68] sm:$0xff] %v1061_v5  ;;  %v1063_v8 = vmul.f32 2.0, %v926_v6 }
 0x248   :  { %1126 = vst [vmem:[#allocation8 + $0x70] sm:$0xff] %v1062_v7 }
 0x249   :  { %1127 = vst [vmem:[#allocation8 + $0x78] sm:$0xff] %v1063_v8  ;;  %v929_v9 = vpop.f32.mrb[16].mxu1 }
 0x24a   :  { %v930_v10 = vadd.f32 %v929_v9, %v1623_v23  ;;  %v931_v11 = vpop.f32.mrb[17].mxu1 }
 0x24b   :  { %v932_v12 = vadd.f32 %v931_v11, %v1627_v37  ;;  %v933_v13 = vpop.f32.mrb[18].mxu1 }
 0x24c   :  { %v1064_v14 = vmul.f32 2.0, %v930_v10  ;;  %v934_v15 = vadd.f32 %v933_v13, %v1623_v23  ;;  %v935_v16 = vpop.f32.mrb[19].mxu1 }
 0x24d   :  { %v1065_v17 = vmul.f32 2.0, %v932_v12  ;;  %v936_v18 = vadd.f32 %v935_v16, %v1627_v37 }
 0x24e   :  { %1128 = vst [vmem:[#allocation8 + $0x80] sm:$0xff] %v1064_v14  ;;  %v1066_v19 = vmul.f32 2.0, %v934_v15 }
 0x24f   :  { %1129 = vst [vmem:[#allocation8 + $0x88] sm:$0xff] %v1065_v17  ;;  %v1067_v20 = vmul.f32 2.0, %v936_v18 }
 0x250   :  { %1130 = vst [vmem:[#allocation8 + $0x90] sm:$0xff] %v1066_v19 }
 0x251   :  { %1131 = vst [vmem:[#allocation8 + $0x98] sm:$0xff] %v1067_v20  ;;  %v939_v21 = vpop.f32.mrb[20].mxu1 }
 0x252   :  { %v940_v22 = vadd.f32 %v939_v21, %v1623_v23  ;;  %v941_v38 = vpop.f32.mrb[21].mxu1 }
 0x253   :  { %v942_v24 = vadd.f32 %v941_v38, %v1627_v37  ;;  %v943_v25 = vpop.f32.mrb[22].mxu1 }
 0x254   :  { %v1068_v26 = vmul.f32 2.0, %v940_v22  ;;  %v944_v27 = vadd.f32 %v943_v25, %v1623_v23  ;;  %v945_v28 = vpop.f32.mrb[23].mxu1 }
 0x255   :  { %v1069_v29 = vmul.f32 2.0, %v942_v24  ;;  %v946_v30 = vadd.f32 %v945_v28, %v1627_v37 }
 0x256   :  { %1132 = vst [vmem:[#allocation8 + $0xa0] sm:$0xff] %v1068_v26  ;;  %v1070_v31 = vmul.f32 2.0, %v944_v27 }
 0x257   :  { %1133 = vst [vmem:[#allocation8 + $0xa8] sm:$0xff] %v1069_v29  ;;  %v1071_v32 = vmul.f32 2.0, %v946_v30 }
 0x258   :  { %1134 = vst [vmem:[#allocation8 + $0xb0] sm:$0xff] %v1070_v31 }
 0x259   :  { %1135 = vst [vmem:[#allocation8 + $0xb8] sm:$0xff] %v1071_v32  ;;  %v949_v34 = vpop.f32.mrb[24].mxu1 }
 0x25a   :  { %v950_v33 = vadd.f32 %v949_v34, %v1623_v23  ;;  %v951_v36 = vpop.f32.mrb[25].mxu1 }
 0x25b   :  { %v952_v35 = vadd.f32 %v951_v36, %v1627_v37  ;;  %v953_v39 = vpop.f32.mrb[26].mxu1 }
 0x25c   :  { %v1072_v40 = vmul.f32 2.0, %v950_v33  ;;  %v954_v41 = vadd.f32 %v953_v39, %v1623_v23  ;;  %v955_v42 = vpop.f32.mrb[27].mxu1 }
 0x25d   :  { %v1073_v43 = vmul.f32 2.0, %v952_v35  ;;  %v956_v44 = vadd.f32 %v955_v42, %v1627_v37 }
 0x25e   :  { %1136 = vst [vmem:[#allocation8 + $0xc0] sm:$0xff] %v1072_v40  ;;  %v1074_v45 = vmul.f32 2.0, %v954_v41 }
 0x25f   :  { %1137 = vst [vmem:[#allocation8 + $0xc8] sm:$0xff] %v1073_v43  ;;  %v1075_v46 = vmul.f32 2.0, %v956_v44 }
 0x260   :  { %1138 = vst [vmem:[#allocation8 + $0xd0] sm:$0xff] %v1074_v45 }
 0x261   :  { %1139 = vst [vmem:[#allocation8 + $0xd8] sm:$0xff] %v1075_v46  ;;  %v959_v47 = vpop.f32.mrb[28].mxu1 }
 0x262   :  { %v960_v48 = vadd.f32 %v959_v47, %v1623_v23  ;;  %v961_v49 = vpop.f32.mrb[29].mxu1 }
 0x263   :  { %v962_v50 = vadd.f32 %v961_v49, %v1627_v37  ;;  %v963_v51 = vpop.f32.mrb[30].mxu1 }
 0x264   :  { %v1076_v52 = vmul.f32 2.0, %v960_v48  ;;  %v964_v53 = vadd.f32 %v963_v51, %v1623_v23  ;;  %v965_v54 = vpop.f32.mrb[31].mxu1 }
 0x265   :  { %v1077_v55 = vmul.f32 2.0, %v962_v50  ;;  %v966_v56 = vadd.f32 %v965_v54, %v1627_v37 }
 0x266   :  { %1140 = vst [vmem:[#allocation8 + $0xe0] sm:$0xff] %v1076_v52  ;;  %v1078_v57 = vmul.f32 2.0, %v964_v53 }
 0x267   :  { %1141 = vst [vmem:[#allocation8 + $0xe8] sm:$0xff] %v1077_v55  ;;  %v1079_v58 = vmul.f32 2.0, %v966_v56 }
 0x268   :  { %1142 = vst [vmem:[#allocation8 + $0xf0] sm:$0xff] %v1078_v57 }
 0x269   :  { %1143 = vst [vmem:[#allocation8 + $0xf8] sm:$0xff] %v1079_v58  ;;  %v969_v59 = vpop.f32.mrb[32].mxu1 }
 0x26a   :  { %v970_v60 = vadd.f32 %v969_v59, %v1623_v23  ;;  %v971_v61 = vpop.f32.mrb[33].mxu1 }
 0x26b   :  { %v972_v62 = vadd.f32 %v971_v61, %v1627_v37  ;;  %v973_v63 = vpop.f32.mrb[34].mxu1 }
 0x26c   :  { %v1080_v0 = vmul.f32 2.0, %v970_v60  ;;  %v974_v1 = vadd.f32 %v973_v63, %v1623_v23  ;;  %v975_v2 = vpop.f32.mrb[35].mxu1 }
 0x26d   :  { %v1081_v3 = vmul.f32 2.0, %v972_v62  ;;  %v976_v4 = vadd.f32 %v975_v2, %v1627_v37 }
 0x26e   :  { %1144 = vst [vmem:[#allocation8 + $0x100] sm:$0xff] %v1080_v0  ;;  %v1082_v5 = vmul.f32 2.0, %v974_v1 }
 0x26f   :  { %1145 = vst [vmem:[#allocation8 + $0x108] sm:$0xff] %v1081_v3  ;;  %v1083_v6 = vmul.f32 2.0, %v976_v4 }
 0x270   :  { %1146 = vst [vmem:[#allocation8 + $0x110] sm:$0xff] %v1082_v5 }
 0x271   :  { %1147 = vst [vmem:[#allocation8 + $0x118] sm:$0xff] %v1083_v6  ;;  %v979_v7 = vpop.f32.mrb[36].mxu1 }
 0x272   :  { %v980_v8 = vadd.f32 %v979_v7, %v1623_v23  ;;  %v981_v9 = vpop.f32.mrb[37].mxu1 }
 0x273   :  { %v982_v10 = vadd.f32 %v981_v9, %v1627_v37  ;;  %v983_v11 = vpop.f32.mrb[38].mxu1 }
 0x274   :  { %v1084_v12 = vmul.f32 2.0, %v980_v8  ;;  %v984_v13 = vadd.f32 %v983_v11, %v1623_v23  ;;  %v985_v14 = vpop.f32.mrb[39].mxu1 }
 0x275   :  { %v1085_v15 = vmul.f32 2.0, %v982_v10  ;;  %v986_v16 = vadd.f32 %v985_v14, %v1627_v37 }
 0x276   :  { %1148 = vst [vmem:[#allocation8 + $0x120] sm:$0xff] %v1084_v12  ;;  %v1086_v17 = vmul.f32 2.0, %v984_v13 }
 0x277   :  { %1149 = vst [vmem:[#allocation8 + $0x128] sm:$0xff] %v1085_v15  ;;  %v1087_v18 = vmul.f32 2.0, %v986_v16 }
 0x278   :  { %1150 = vst [vmem:[#allocation8 + $0x130] sm:$0xff] %v1086_v17 }
 0x279   :  { %1151 = vst [vmem:[#allocation8 + $0x138] sm:$0xff] %v1087_v18  ;;  %v989_v19 = vpop.f32.mrb[40].mxu1 }
 0x27a   :  { %v990_v20 = vadd.f32 %v989_v19, %v1623_v23  ;;  %v991_v21 = vpop.f32.mrb[41].mxu1 }
 0x27b   :  { %v992_v22 = vadd.f32 %v991_v21, %v1627_v37  ;;  %v993_v38 = vpop.f32.mrb[42].mxu1 }
 0x27c   :  { %v1088_v24 = vmul.f32 2.0, %v990_v20  ;;  %v994_v25 = vadd.f32 %v993_v38, %v1623_v23  ;;  %v995_v26 = vpop.f32.mrb[43].mxu1 }
 0x27d   :  { %v1089_v27 = vmul.f32 2.0, %v992_v22  ;;  %v996_v28 = vadd.f32 %v995_v26, %v1627_v37 }
 0x27e   :  { %1152 = vst [vmem:[#allocation8 + $0x140] sm:$0xff] %v1088_v24  ;;  %v1090_v29 = vmul.f32 2.0, %v994_v25 }
 0x27f   :  { %1153 = vst [vmem:[#allocation8 + $0x148] sm:$0xff] %v1089_v27  ;;  %v1091_v30 = vmul.f32 2.0, %v996_v28 }
 0x280   :  { %1154 = vst [vmem:[#allocation8 + $0x150] sm:$0xff] %v1090_v29 }
 0x281   :  { %1155 = vst [vmem:[#allocation8 + $0x158] sm:$0xff] %v1091_v30  ;;  %v999_v31 = vpop.f32.mrb[44].mxu1 }
 0x282   :  { %v1000_v32 = vadd.f32 %v999_v31, %v1623_v23  ;;  %v1001_v34 = vpop.f32.mrb[45].mxu1 }
 0x283   :  { %v1002_v33 = vadd.f32 %v1001_v34, %v1627_v37  ;;  %v1003_v36 = vpop.f32.mrb[46].mxu1 }
 0x284   :  { %v1092_v35 = vmul.f32 2.0, %v1000_v32  ;;  %v1004_v39 = vadd.f32 %v1003_v36, %v1623_v23  ;;  %v1005_v40 = vpop.f32.mrb[47].mxu1 }
 0x285   :  { %v1093_v41 = vmul.f32 2.0, %v1002_v33  ;;  %v1006_v42 = vadd.f32 %v1005_v40, %v1627_v37 }
 0x286   :  { %1156 = vst [vmem:[#allocation8 + $0x160] sm:$0xff] %v1092_v35  ;;  %v1094_v43 = vmul.f32 2.0, %v1004_v39 }
 0x287   :  { %1157 = vst [vmem:[#allocation8 + $0x168] sm:$0xff] %v1093_v41  ;;  %v1095_v44 = vmul.f32 2.0, %v1006_v42 }
 0x288   :  { %1158 = vst [vmem:[#allocation8 + $0x170] sm:$0xff] %v1094_v43 }
 0x289   :  { %1159 = vst [vmem:[#allocation8 + $0x178] sm:$0xff] %v1095_v44  ;;  %v1009_v45 = vpop.f32.mrb[48].mxu1 }
 0x28a   :  { %v1010_v46 = vadd.f32 %v1009_v45, %v1623_v23  ;;  %v1011_v47 = vpop.f32.mrb[49].mxu1 }
 0x28b   :  { %v1012_v48 = vadd.f32 %v1011_v47, %v1627_v37  ;;  %v1013_v49 = vpop.f32.mrb[50].mxu1 }
 0x28c   :  { %v1096_v50 = vmul.f32 2.0, %v1010_v46  ;;  %v1014_v51 = vadd.f32 %v1013_v49, %v1623_v23  ;;  %v1015_v52 = vpop.f32.mrb[51].mxu1 }
 0x28d   :  { %v1097_v53 = vmul.f32 2.0, %v1012_v48  ;;  %v1016_v54 = vadd.f32 %v1015_v52, %v1627_v37 }
 0x28e   :  { %1160 = vst [vmem:[#allocation8 + $0x180] sm:$0xff] %v1096_v50  ;;  %v1098_v55 = vmul.f32 2.0, %v1014_v51 }
 0x28f   :  { %1161 = vst [vmem:[#allocation8 + $0x188] sm:$0xff] %v1097_v53  ;;  %v1099_v56 = vmul.f32 2.0, %v1016_v54 }
 0x290   :  { %1162 = vst [vmem:[#allocation8 + $0x190] sm:$0xff] %v1098_v55 }
 0x291   :  { %1163 = vst [vmem:[#allocation8 + $0x198] sm:$0xff] %v1099_v56  ;;  %v1019_v57 = vpop.f32.mrb[52].mxu1 }
 0x292   :  { %v1020_v58 = vadd.f32 %v1019_v57, %v1623_v23  ;;  %v1021_v59 = vpop.f32.mrb[53].mxu1 }
 0x293   :  { %v1022_v60 = vadd.f32 %v1021_v59, %v1627_v37  ;;  %v1023_v61 = vpop.f32.mrb[54].mxu1 }
 0x294   :  { %v1100_v62 = vmul.f32 2.0, %v1020_v58  ;;  %v1024_v63 = vadd.f32 %v1023_v61, %v1623_v23  ;;  %v1025_v0 = vpop.f32.mrb[55].mxu1 }
 0x295   :  { %v1101_v1 = vmul.f32 2.0, %v1022_v60  ;;  %v1026_v2 = vadd.f32 %v1025_v0, %v1627_v37 }
 0x296   :  { %1164 = vst [vmem:[#allocation8 + $0x1a0] sm:$0xff] %v1100_v62  ;;  %v1102_v3 = vmul.f32 2.0, %v1024_v63 }
 0x297   :  { %1165 = vst [vmem:[#allocation8 + $0x1a8] sm:$0xff] %v1101_v1  ;;  %v1103_v4 = vmul.f32 2.0, %v1026_v2 }
 0x298   :  { %1166 = vst [vmem:[#allocation8 + $0x1b0] sm:$0xff] %v1102_v3 }
 0x299   :  { %1167 = vst [vmem:[#allocation8 + $0x1b8] sm:$0xff] %v1103_v4  ;;  %v1029_v5 = vpop.f32.mrb[56].mxu1 }
 0x29a   :  { %v1030_v6 = vadd.f32 %v1029_v5, %v1623_v23  ;;  %v1031_v7 = vpop.f32.mrb[57].mxu1 }
 0x29b   :  { %v1032_v8 = vadd.f32 %v1031_v7, %v1627_v37  ;;  %v1033_v9 = vpop.f32.mrb[58].mxu1 }
 0x29c   :  { %v1104_v10 = vmul.f32 2.0, %v1030_v6  ;;  %v1034_v11 = vadd.f32 %v1033_v9, %v1623_v23  ;;  %v1035_v12 = vpop.f32.mrb[59].mxu1 }
 0x29d   :  { %v1105_v13 = vmul.f32 2.0, %v1032_v8  ;;  %v1036_v14 = vadd.f32 %v1035_v12, %v1627_v37 }
 0x29e   :  { %1168 = vst [vmem:[#allocation8 + $0x1c0] sm:$0xff] %v1104_v10  ;;  %v1106_v15 = vmul.f32 2.0, %v1034_v11 }
 0x29f   :  { %1169 = vst [vmem:[#allocation8 + $0x1c8] sm:$0xff] %v1105_v13  ;;  %v1107_v16 = vmul.f32 2.0, %v1036_v14 }
 0x2a0   :  { %1170 = vst [vmem:[#allocation8 + $0x1d0] sm:$0xff] %v1106_v15 }
 0x2a1   :  { %1171 = vst [vmem:[#allocation8 + $0x1d8] sm:$0xff] %v1107_v16  ;;  %v1039_v17 = vpop.f32.mrb[60].mxu1 }
 0x2a2   :  { %v1040_v18 = vadd.f32 %v1039_v17, %v1623_v23  ;;  %v1041_v19 = vpop.f32.mrb[61].mxu1 }
 0x2a3   :  { %v1042_v20 = vadd.f32 %v1041_v19, %v1627_v37  ;;  %v1043_v21 = vpop.f32.mrb[62].mxu1 }
 0x2a4   :  { %v1108_v22 = vmul.f32 2.0, %v1040_v18  ;;  %v1044_v38 = vadd.f32 %v1043_v21, %v1623_v23  ;;  %v1045_v24 = vpop.f32.mrb[63].mxu1 }
 0x2a5   :  { %v1109_v25 = vmul.f32 2.0, %v1042_v20  ;;  %v1046_v26 = vadd.f32 %v1045_v24, %v1627_v37 }
 0x2a6   :  { %1172 = vst [vmem:[#allocation8 + $0x1e0] sm:$0xff] %v1108_v22  ;;  %v1110_v27 = vmul.f32 2.0, %v1044_v38 }
 0x2a7   :  { %1173 = vst [vmem:[#allocation8 + $0x1e8] sm:$0xff] %v1109_v25  ;;  %v1111_v28 = vmul.f32 2.0, %v1046_v26 }
 0x2a8   :  { %1174 = vst [vmem:[#allocation8 + $0x1f0] sm:$0xff] %v1110_v27 }
 0x2a9   :  { %1175 = vst [vmem:[#allocation8 + $0x1f8] sm:$0xff] %v1111_v28 }
 0x2aa   :  { %1439 = shalt.err (!%p1436_p0)
}
 0x2ab   :  { %s1440_s12 = scalar_lea.hbm %s1713_s5, 8192 }
 0x2ac   :  { %p1441_p1 = scmp.ne.s32.totalorder %s1713_s5, %s1440_s12  ;;  %p1444_p2 = scmp.lt.u32.totalorder %s1440_s12, %s1713_s5 }
 0x2ae   :  { %p1446_p3 = pnand %p1444_p2, %p1441_p1 }
 0x2b0   :  { %1449 = shalt.err (!%p1446_p3)
}
 0x2b1   :  { %1187 = dma.vmem_to_hbm [thread:$0]  %s1182_s8, 8192, %s1713_s5, [#allocation4], %s1460_s1, %s1460_s1, %s1461_s17  }
 0x2b2   :  { %1454 = dma.done.wait [#allocation4], 8192  }
 0x2b3   :  { %1455 = vsyncadd [#allocation4], 4294959104 }
 0x2b4   :  { %1191 = vsyncpa [#allocation3], 1 }
 0x2b5   :  { %1192 = vsyncpa [#allocation6], 1 }
 0x2b6   :  { %1193 = vsyncpa [#allocation4], 1 }

</bundles_post_ra>
